<compile_context>
chip_gen: v7x
topology: tpu7x:2x2x1
jax: 0.10.0
libtpu: 0.0.40
codegen_flags: <defaults>
</compile_context>

<pallas_src>
import jax
import jax.numpy as jnp
from jax.experimental import pallas as pl
from jax.experimental.pallas import tpu as pltpu


# ---------------------------------------------------------------------------
# Model hyper-parameters (synthetic, deterministic)
# ---------------------------------------------------------------------------
INPUT_DIM = 64        # input_dim of the first Linear
HIDDEN = 1024         # linear: input_dim -> 1024, chunked into 2 x 512
HALF = HIDDEN // 2    # 512
N_ACTIONS = 4
N_ATOMS = 51
A_PAD = 128           # per-action lane group (atoms padded 51 -> 128)
OUT_PAD = N_ACTIONS * A_PAD   # 512: fused, lane-dense kernel output width
V_MIN = -10.0
V_MAX = 10.0
NEG_PAD = -1e30       # finite pad bias -> exp() underflows to 0, no inf-inf NaN
SUBLANE = 8


# ---------------------------------------------------------------------------
# Kernel: whole forward pass for one batch tile
# ---------------------------------------------------------------------------
def _dqn_kernel(x_ref, w1_ref, b1_ref, w2_ref, b2_ref, q_ref):
    """x_ref : (tb, INPUT_DIM)            bf16
       w1_ref: (INPUT_DIM, HIDDEN)        bf16
       b1_ref: (1, HIDDEN)                f32
       w2_ref: (HIDDEN, OUT_PAD)          bf16  (dueling-folded adv+val weight)
       b2_ref: (1, OUT_PAD)               f32   (pad lanes = -1e30)
       q_ref : (tb, OUT_PAD)              bf16  softmax probs per action group
    """
    # h = relu(x @ W1 + b1)  -> (tb, 1024), f32 accumulation on the MXU.
    h = jnp.dot(x_ref[...], w1_ref[...], preferred_element_type=jnp.float32)
    h = jnp.maximum(h + b1_ref[...], 0.0)

    # Single fused, lane-dense matmul producing the final dueling logits for
    # all actions at once: logits[:, a*128 + j] = (ya - mean + ys)[:, a, j].
    logits = jnp.dot(h.astype(jnp.bfloat16), w2_ref[...],
                     preferred_element_type=jnp.float32) + b2_ref[...]

    # Per-action softmax over each 128-lane group (pad lanes are -1e30 so they
    # contribute exp()=0).  All slices / stores are 128-lane aligned.
    # Softmax math stays f32; only the final store is bf16.  The approx
    # reciprocal runs on the EUP slot (free); its ~1e-3 relative error is
    # below the bf16 store rounding anyway.
    for a in range(N_ACTIONS):                              # static 4-iter loop
        la = logits[:, a * A_PAD:(a + 1) * A_PAD]           # (tb, 128)
        la = la - jnp.max(la, axis=-1, keepdims=True)
        e = jnp.exp(la)
        inv = pl.reciprocal(jnp.sum(e, axis=-1, keepdims=True), approx=True)
        q_ref[:, a * A_PAD:(a + 1) * A_PAD] = (e * inv).astype(q_ref.dtype)


# ---------------------------------------------------------------------------
# Wrapper
# ---------------------------------------------------------------------------
def _round_up(x, m):
    return ((x + m - 1) // m) * m


def _num_tensorcores_per_chip():
    """Best-effort: v7x has 2 TensorCores per chip; earlier gens have 1."""
    try:
        kind = jax.devices()[0].device_kind.lower()
    except Exception:
        return 1
    return 2 if "v7" in kind else 1


def distributional_dueling_dqn_forward(x, packed, *, block_bs=512,
                                       out_dtype=None):
    """Returns (q, z_values): q is (bs, n_actions, n_atoms) probabilities.

    q is bf16 by default (halves the output writeback, which is the roofline
    limiter on v6e/v7x at large batch); pass out_dtype=jnp.float32 to upcast.
    """
    bs = x.shape[0]
    xb = x.astype(jnp.bfloat16)

    # Pad the batch only to a sublane multiple (8), not to a full tile, so at
    # most 7 wasted rows of DMA/MXU/exp/writeback regardless of tile size.
    pad = (-bs) % SUBLANE
    if pad:
        xb = jnp.pad(xb, ((0, pad), (0, 0)))
    pbs = xb.shape[0]

    tb = min(block_bs, pbs)
    # v7x megacore guard: ensure the "parallel" batch axis has >= 2 blocks so
    # both TensorCores get work instead of one idling.
    n_tc = _num_tensorcores_per_chip()
    if n_tc >= 2 and pbs > 128:
        tb = min(tb, _round_up(pl.cdiv(pbs, n_tc), SUBLANE))
    n_blocks = pl.cdiv(pbs, tb)   # partial final tile is masked by Pallas

    q_flat = pl.pallas_call(
        _dqn_kernel,
        out_shape=jax.ShapeDtypeStruct((pbs, OUT_PAD), jnp.bfloat16),
        grid=(n_blocks,),
        in_specs=[
            pl.BlockSpec((tb, INPUT_DIM), lambda i: (i, 0)),       # x: tiled
            # Weights/biases use constant index maps: fetched once, kept
            # VMEM-resident across grid steps (no per-step re-DMA).  Total
            # VMEM at tb=512 is ~6.5 MiB, so no single-buffering needed.
            pl.BlockSpec((INPUT_DIM, HIDDEN), lambda i: (0, 0)),
            pl.BlockSpec((1, HIDDEN), lambda i: (0, 0)),
            pl.BlockSpec((HIDDEN, OUT_PAD), lambda i: (0, 0)),
            pl.BlockSpec((1, OUT_PAD), lambda i: (0, 0)),
        ],
        out_specs=pl.BlockSpec((tb, OUT_PAD), lambda i: (i, 0)),
        compiler_params=pltpu.CompilerParams(
            dimension_semantics=("parallel",)),
    )(xb, packed["w1"], packed["b1"], packed["w2"], packed["b2"])

    # Contiguous reshape + slice strips the batch pad and the 128-lane atom
    # padding (no transpose, no masked stores inside the kernel).
    q = q_flat[:bs].reshape(bs, N_ACTIONS, A_PAD)[:, :, :N_ATOMS]
    if out_dtype is not None:
        q = q.astype(out_dtype)
    z_values = jnp.linspace(V_MIN, V_MAX, N_ATOMS, dtype=jnp.float32)
    return q, z_values


# ---------------------------------------------------------------------------
# Parameters: raw (PyTorch-layout-ish) init + packing into the fused layout
# ---------------------------------------------------------------------------
def make_params(key):
    k1, k2, k3, k4, k5, k6 = jax.random.split(key, 6)
    w1 = jax.random.normal(k1, (INPUT_DIM, HIDDEN), jnp.float32) / jnp.sqrt(INPUT_DIM)
    b1 = 0.1 * jax.random.normal(k4, (HIDDEN,), jnp.float32)
    # a_stream: Linear(512, n_actions * n_atoms), stored (in, out)
    wa = jax.random.normal(k2, (HALF, N_ACTIONS * N_ATOMS), jnp.float32) / jnp.sqrt(HALF)
    ba = 0.1 * jax.random.normal(k5, (N_ACTIONS * N_ATOMS,), jnp.float32)
    # v_stream: Linear(512, n_atoms), stored (in, out)
    wv = jax.random.normal(k3, (HALF, N_ATOMS), jnp.float32) / jnp.sqrt(HALF)
    bv = 0.1 * jax.random.normal(k6, (N_ATOMS,), jnp.float32)
    return {"w1": w1, "b1": b1, "wa": wa, "ba": ba, "wv": wv, "bv": bv}


def pack_params(params):
    """Fold dueling combination (ya - mean_a(ya) + ys) into one weight slab.

    Builds W2/B2 of width N_ACTIONS*128 where column a*128 + j (j < 51) holds
    the full dueling logit weight for (action a, atom j); pad columns have
    zero weight and a -1e30 bias so they disappear under softmax.
    """
    w1 = params["w1"].astype(jnp.bfloat16)
    b1 = params["b1"].reshape(1, HIDDEN).astype(jnp.float32)

    wa3 = params["wa"].reshape(HALF, N_ACTIONS, N_ATOMS)
    wa3 = wa3 - wa3.mean(axis=1, keepdims=True)            # fold "- mean_a"
    ba3 = params["ba"].reshape(N_ACTIONS, N_ATOMS)
    ba3 = ba3 - ba3.mean(axis=0, keepdims=True)
    wv = params["wv"]                                       # (512, 51)
    bv = params["bv"]                                       # (51,)

    w2 = jnp.zeros((HIDDEN, N_ACTIONS, A_PAD), jnp.float32)
    w2 = w2.at[:HALF, :, :N_ATOMS].set(wa3)                 # advantage half
    w2 = w2.at[HALF:, :, :N_ATOMS].set(                     # value half
        jnp.broadcast_to(wv[:, None, :], (HALF, N_ACTIONS, N_ATOMS)))
    w2 = w2.reshape(HIDDEN, OUT_PAD).astype(jnp.bfloat16)

    b2 = jnp.full((N_ACTIONS, A_PAD), NEG_PAD, jnp.float32)
    b2 = b2.at[:, :N_ATOMS].set(ba3 + bv[None, :])
    b2 = b2.reshape(1, OUT_PAD)

    return {"w1": w1, "b1": b1, "w2": w2, "b2": b2}


# ---------------------------------------------------------------------------
# Pure-JAX f32 replica of the PyTorch forward (sanity check)
# ---------------------------------------------------------------------------
def _reference_forward(x, params):
    h = jnp.maximum(x @ params["w1"] + params["b1"], 0.0)
    h_a, h_v = h[:, :HALF], h[:, HALF:]
    ya = (h_a @ params["wa"] + params["ba"]).reshape(-1, N_ACTIONS, N_ATOMS)
    mean = ya.sum(axis=1, keepdims=True) / N_ACTIONS
    ys = (h_v @ params["wv"] + params["bv"]).reshape(-1, 1, N_ATOMS)
    return jax.nn.softmax(ya - mean + ys, axis=2)


if __name__ == "__main__":
    key = jax.random.PRNGKey(0)
    pkey, xkey, xkey2 = jax.random.split(key, 3)
    params = make_params(pkey)
    packed = pack_params(params)

    # --- tiny batch (act()-style): single block, batch padded to 8 ---------
    bs = 2
    x = jax.random.normal(xkey, (bs, INPUT_DIM), jnp.float32)
    q, z = distributional_dueling_dqn_forward(x, packed)
    q = jax.block_until_ready(q)
    z = jax.block_until_ready(z)

    assert q.shape == (bs, N_ACTIONS, N_ATOMS)
    assert z.shape == (N_ATOMS,)

    q_ref = _reference_forward(x, params)
    # bf16 matmul inputs + bf16 output store + EUP approx reciprocal ->
    # relaxed tolerance vs the f32 reference.
    qf = q.astype(jnp.float32)
    assert jnp.allclose(qf, q_ref, atol=2.5e-2), "mismatch vs JAX reference (bs=2)"
    assert jnp.allclose(qf.sum(axis=-1), 1.0, atol=1.5e-2), "softmax not normalized"

    # --- multi-block path: sublane-only batch pad + partial final tile -----
    bs2 = 275                                   # pads to 280; tiles of 128
    x2 = jax.random.normal(xkey2, (bs2, INPUT_DIM), jnp.float32)
    q2, _ = distributional_dueling_dqn_forward(x2, packed, block_bs=128)
    q2 = jax.block_until_ready(q2)
    assert q2.shape == (bs2, N_ACTIONS, N_ATOMS)
    q2_ref = _reference_forward(x2, params)
    assert jnp.allclose(q2.astype(jnp.float32), q2_ref, atol=2.5e-2), \
        "mismatch vs JAX reference (bs=275, tiled)"

    print("KERNEL_OK")
</pallas_src>

<mosaic_0001>
module attributes {stable_mosaic.version = 11 : i64} {
  func.func @_dqn_kernel(%arg0: i32, %arg1: memref<8x64xbf16, #tpu.memory_space<vmem>>, %arg2: memref<64x1024xbf16, #tpu.memory_space<vmem>>, %arg3: memref<1x1024xf32, #tpu.memory_space<vmem>>, %arg4: memref<1024x512xbf16, #tpu.memory_space<vmem>>, %arg5: memref<1x512xf32, #tpu.memory_space<vmem>>, %arg6: memref<8x512xbf16, #tpu.memory_space<vmem>>) attributes {dimension_semantics = [#tpu.dimension_semantics<parallel>], iteration_bounds = array<i64: 1>, scalar_prefetch = 0 : i64, scratch_operands = 0 : i64, tpu.core_type = #tpu.core_type<tc>, window_params = [{transform_indices = @transform_0, window_bounds = array<i64: 8, 64>}, {pipeline_mode = #tpu.pipeline_mode<synchronous>, transform_indices = @transform_1, window_bounds = array<i64: 64, 1024>}, {pipeline_mode = #tpu.pipeline_mode<synchronous>, transform_indices = @transform_2, window_bounds = array<i64: 1, 1024>}, {pipeline_mode = #tpu.pipeline_mode<synchronous>, transform_indices = @transform_3, window_bounds = array<i64: 1024, 512>}, {pipeline_mode = #tpu.pipeline_mode<synchronous>, transform_indices = @transform_4, window_bounds = array<i64: 1, 512>}, {transform_indices = @transform_5, window_bounds = array<i64: 8, 512>}]} {
    %c0 = arith.constant 0 : index
    %c0_0 = arith.constant 0 : index
    %0 = vector.load %arg1[%c0, %c0_0] : memref<8x64xbf16, #tpu.memory_space<vmem>>, vector<8x64xbf16>
    %c0_1 = arith.constant 0 : index
    %c0_2 = arith.constant 0 : index
    %1 = vector.load %arg2[%c0_1, %c0_2] : memref<64x1024xbf16, #tpu.memory_space<vmem>>, vector<64x1024xbf16>
    %cst = arith.constant dense<0.000000e+00> : vector<8x1024xf32>
    %2 = tpu.matmul %0, %1, %cst {dimension_numbers = #tpu.dot_dimension_numbers<[1], [0], [0], [1], [0, 0, 1, 1], [], []>} : vector<8x64xbf16>, vector<64x1024xbf16>, vector<8x1024xf32> -> vector<8x1024xf32>
    %c0_3 = arith.constant 0 : index
    %c0_4 = arith.constant 0 : index
    %3 = vector.load %arg3[%c0_3, %c0_4] : memref<1x1024xf32, #tpu.memory_space<vmem>>, vector<1x1024xf32>
    %4 = vector.broadcast %3 : vector<1x1024xf32> to vector<8x1024xf32>
    %5 = arith.addf %2, %4 : vector<8x1024xf32>
    %cst_5 = arith.constant 0.000000e+00 : f32
    %6 = vector.broadcast %cst_5 : f32 to vector<8x1024xf32>
    %7 = arith.maximumf %5, %6 : vector<8x1024xf32>
    %8 = arith.truncf %7 : vector<8x1024xf32> to vector<8x1024xbf16>
    %c0_6 = arith.constant 0 : index
    %c0_7 = arith.constant 0 : index
    %9 = vector.load %arg4[%c0_6, %c0_7] : memref<1024x512xbf16, #tpu.memory_space<vmem>>, vector<1024x512xbf16>
    %cst_8 = arith.constant dense<0.000000e+00> : vector<8x512xf32>
    %10 = tpu.matmul %8, %9, %cst_8 {dimension_numbers = #tpu.dot_dimension_numbers<[1], [0], [0], [1], [0, 0, 1, 1], [], []>} : vector<8x1024xbf16>, vector<1024x512xbf16>, vector<8x512xf32> -> vector<8x512xf32>
    %c0_9 = arith.constant 0 : index
    %c0_10 = arith.constant 0 : index
    %11 = vector.load %arg5[%c0_9, %c0_10] : memref<1x512xf32, #tpu.memory_space<vmem>>, vector<1x512xf32>
    %12 = vector.broadcast %11 : vector<1x512xf32> to vector<8x512xf32>
    %13 = arith.addf %10, %12 : vector<8x512xf32>
    %14 = vector.extract_strided_slice %13 {offsets = [0, 0], sizes = [8, 128], strides = [1, 1]} : vector<8x512xf32> to vector<8x128xf32>
    %cst_11 = arith.constant dense<0xFF800000> : vector<8xf32>
    %15 = vector.multi_reduction <maximumf>, %14, %cst_11 [1] : vector<8x128xf32> to vector<8xf32>
    %16 = vector.shape_cast %15 : vector<8xf32> to vector<8x1xf32>
    %17 = vector.broadcast %16 : vector<8x1xf32> to vector<8x128xf32>
    %18 = arith.subf %14, %17 : vector<8x128xf32>
    %19 = math.exp %18 : vector<8x128xf32>
    %cst_12 = arith.constant dense<0.000000e+00> : vector<8xf32>
    %20 = vector.multi_reduction <add>, %19, %cst_12 [1] : vector<8x128xf32> to vector<8xf32>
    %21 = vector.shape_cast %20 : vector<8xf32> to vector<8x1xf32>
    %22 = tpu.reciprocal %21 {approx = true} : vector<8x1xf32> -> vector<8x1xf32>
    %23 = vector.broadcast %22 : vector<8x1xf32> to vector<8x128xf32>
    %24 = arith.mulf %19, %23 : vector<8x128xf32>
    %25 = arith.truncf %24 : vector<8x128xf32> to vector<8x128xbf16>
    %c0_13 = arith.constant 0 : index
    %c0_14 = arith.constant 0 : index
    %26 = vector.load %arg6[%c0_13, %c0_14] : memref<8x512xbf16, #tpu.memory_space<vmem>>, vector<8x128xbf16>
    tpu.vector_store %arg6[%c0_13, %c0_14], %25 {strides = array<i32>} : memref<8x512xbf16, #tpu.memory_space<vmem>>, vector<8x128xbf16>,
    %27 = vector.extract_strided_slice %13 {offsets = [0, 128], sizes = [8, 128], strides = [1, 1]} : vector<8x512xf32> to vector<8x128xf32>
    %cst_15 = arith.constant dense<0xFF800000> : vector<8xf32>
    %28 = vector.multi_reduction <maximumf>, %27, %cst_15 [1] : vector<8x128xf32> to vector<8xf32>
    %29 = vector.shape_cast %28 : vector<8xf32> to vector<8x1xf32>
    %30 = vector.broadcast %29 : vector<8x1xf32> to vector<8x128xf32>
    %31 = arith.subf %27, %30 : vector<8x128xf32>
    %32 = math.exp %31 : vector<8x128xf32>
    %cst_16 = arith.constant dense<0.000000e+00> : vector<8xf32>
    %33 = vector.multi_reduction <add>, %32, %cst_16 [1] : vector<8x128xf32> to vector<8xf32>
    %34 = vector.shape_cast %33 : vector<8xf32> to vector<8x1xf32>
    %35 = tpu.reciprocal %34 {approx = true} : vector<8x1xf32> -> vector<8x1xf32>
    %36 = vector.broadcast %35 : vector<8x1xf32> to vector<8x128xf32>
    %37 = arith.mulf %32, %36 : vector<8x128xf32>
    %38 = arith.truncf %37 : vector<8x128xf32> to vector<8x128xbf16>
    %c0_17 = arith.constant 0 : index
    %c128 = arith.constant 128 : index
    %39 = vector.load %arg6[%c0_17, %c128] : memref<8x512xbf16, #tpu.memory_space<vmem>>, vector<8x128xbf16>
    tpu.vector_store %arg6[%c0_17, %c128], %38 {strides = array<i32>} : memref<8x512xbf16, #tpu.memory_space<vmem>>, vector<8x128xbf16>,
    %40 = vector.extract_strided_slice %13 {offsets = [0, 256], sizes = [8, 128], strides = [1, 1]} : vector<8x512xf32> to vector<8x128xf32>
    %cst_18 = arith.constant dense<0xFF800000> : vector<8xf32>
    %41 = vector.multi_reduction <maximumf>, %40, %cst_18 [1] : vector<8x128xf32> to vector<8xf32>
    %42 = vector.shape_cast %41 : vector<8xf32> to vector<8x1xf32>
    %43 = vector.broadcast %42 : vector<8x1xf32> to vector<8x128xf32>
    %44 = arith.subf %40, %43 : vector<8x128xf32>
    %45 = math.exp %44 : vector<8x128xf32>
    %cst_19 = arith.constant dense<0.000000e+00> : vector<8xf32>
    %46 = vector.multi_reduction <add>, %45, %cst_19 [1] : vector<8x128xf32> to vector<8xf32>
    %47 = vector.shape_cast %46 : vector<8xf32> to vector<8x1xf32>
    %48 = tpu.reciprocal %47 {approx = true} : vector<8x1xf32> -> vector<8x1xf32>
    %49 = vector.broadcast %48 : vector<8x1xf32> to vector<8x128xf32>
    %50 = arith.mulf %45, %49 : vector<8x128xf32>
    %51 = arith.truncf %50 : vector<8x128xf32> to vector<8x128xbf16>
    %c0_20 = arith.constant 0 : index
    %c256 = arith.constant 256 : index
    %52 = vector.load %arg6[%c0_20, %c256] : memref<8x512xbf16, #tpu.memory_space<vmem>>, vector<8x128xbf16>
    tpu.vector_store %arg6[%c0_20, %c256], %51 {strides = array<i32>} : memref<8x512xbf16, #tpu.memory_space<vmem>>, vector<8x128xbf16>,
    %53 = vector.extract_strided_slice %13 {offsets = [0, 384], sizes = [8, 128], strides = [1, 1]} : vector<8x512xf32> to vector<8x128xf32>
    %cst_21 = arith.constant dense<0xFF800000> : vector<8xf32>
    %54 = vector.multi_reduction <maximumf>, %53, %cst_21 [1] : vector<8x128xf32> to vector<8xf32>
    %55 = vector.shape_cast %54 : vector<8xf32> to vector<8x1xf32>
    %56 = vector.broadcast %55 : vector<8x1xf32> to vector<8x128xf32>
    %57 = arith.subf %53, %56 : vector<8x128xf32>
    %58 = math.exp %57 : vector<8x128xf32>
    %cst_22 = arith.constant dense<0.000000e+00> : vector<8xf32>
    %59 = vector.multi_reduction <add>, %58, %cst_22 [1] : vector<8x128xf32> to vector<8xf32>
    %60 = vector.shape_cast %59 : vector<8xf32> to vector<8x1xf32>
    %61 = tpu.reciprocal %60 {approx = true} : vector<8x1xf32> -> vector<8x1xf32>
    %62 = vector.broadcast %61 : vector<8x1xf32> to vector<8x128xf32>
    %63 = arith.mulf %58, %62 : vector<8x128xf32>
    %64 = arith.truncf %63 : vector<8x128xf32> to vector<8x128xbf16>
    %c0_23 = arith.constant 0 : index
    %c384 = arith.constant 384 : index
    %65 = vector.load %arg6[%c0_23, %c384] : memref<8x512xbf16, #tpu.memory_space<vmem>>, vector<8x128xbf16>
    tpu.vector_store %arg6[%c0_23, %c384], %64 {strides = array<i32>} : memref<8x512xbf16, #tpu.memory_space<vmem>>, vector<8x128xbf16>,
    return
  }
  func.func @transform_0(%arg0: i32) -> (i32, i32) {
    %c0_i32 = arith.constant 0 : i32
    %c0_i32_0 = arith.constant 0 : i32
    return %arg0, %c0_i32 : i32, i32
  }
  func.func @transform_1(%arg0: i32) -> (i32, i32) {
    %c0_i32 = arith.constant 0 : i32
    %c0_i32_0 = arith.constant 0 : i32
    %c0_i32_1 = arith.constant 0 : i32
    return %c0_i32, %c0_i32_0 : i32, i32
  }
  func.func @transform_2(%arg0: i32) -> (i32, i32) {
    %c0_i32 = arith.constant 0 : i32
    %c0_i32_0 = arith.constant 0 : i32
    %c0_i32_1 = arith.constant 0 : i32
    return %c0_i32, %c0_i32_0 : i32, i32
  }
  func.func @transform_3(%arg0: i32) -> (i32, i32) {
    %c0_i32 = arith.constant 0 : i32
    %c0_i32_0 = arith.constant 0 : i32
    %c0_i32_1 = arith.constant 0 : i32
    return %c0_i32, %c0_i32_0 : i32, i32
  }
  func.func @transform_4(%arg0: i32) -> (i32, i32) {
    %c0_i32 = arith.constant 0 : i32
    %c0_i32_0 = arith.constant 0 : i32
    %c0_i32_1 = arith.constant 0 : i32
    return %c0_i32, %c0_i32_0 : i32, i32
  }
  func.func @transform_5(%arg0: i32) -> (i32, i32) {
    %c0_i32 = arith.constant 0 : i32
    %c0_i32_0 = arith.constant 0 : i32
    return %arg0, %c0_i32 : i32, i32
  }
}

</mosaic_0001>

<bundles_post_ra>
// kernel: tpu_custom_call.1
= control target key start
LH: loop header
LB: loop body
LE: loop exit
PB: predicated region body
PF: predicated region fallthrough
CT: control target
= control target key end

     0   :  { %10 = vsyncpa [#allocation3], 0  ;;  %s3449_s0 = inlined_call_operand.hbm [shape: bf16[8,64], index: 0, kind: input, shape index: {}]   ;;  %s3450_s1 = inlined_call_operand.hbm [shape: bf16[64,1024], index: 1, kind: input, shape index: {}]   ;;  %s3451_s2 = inlined_call_operand.hbm [shape: f32[1,1024], index: 2, kind: input, shape index: {}]   ;;  %s3452_s3 = inlined_call_operand.hbm [shape: bf16[1024,512], index: 3, kind: input, shape index: {}]   ;;  %s3453_s4 = inlined_call_operand.vmem [shape: f32[1,512], index: 4, kind: input, shape index: {}]   ;;  %s3454_s5 = inlined_call_operand.hbm [shape: bf16[8,512], index: 5, kind: output, shape index: {}]  }
   0x1   :  { %11 = vsyncpa [#allocation6], 0 }
   0x2   :  { %12 = vsyncpa [#allocation9], 0 }
   0x3   :  { %13 = vsyncpa [#allocation4], 0  ;;  %s3287_s18 = smov [#allocation5]   ;;  %s3169_s22 = scalar_lea.hbm %s3450_s1, 4096 }
   0x4   :  { %s29_s19 = sshll.u32 %s3287_s18, 4  ;;  %p3170_p0 = scmp.ne.s32.totalorder %s3450_s1, %s3169_s22  ;;  %s30_s19 = int_to_ptr.vmem [resolvable:$true] %s29_s19 }
   0x5   :  { %p3173_p1 = scmp.lt.u32.totalorder %s3169_s22, %s3450_s1 }
   0x7   :  { %p3175_p2 = pnand %p3173_p1, %p3170_p0 }
   0x9   :  { %3178 = shalt.err (!%p3175_p2)
}
   0xa   :  { %s3179_s27 = scalar_lea.vmem %s30_s19, 4096  ;;  %p3184_p4 = scmp.lt.s32.totalorder %s30_s19, %s30_s19 }
   0xb   :  { %p3180_p3 = scmp.ne.s32.totalorder %s30_s19, %s3179_s27  ;;  %p3185_p5 = scmp.lt.s32.totalorder %s3179_s27, %s3179_s27 }
   0xd   :  { %p3186_p6 = por %p3185_p5, %p3184_p4 }
   0xf   :  { %p3187_p7 = pnand %p3186_p6, %p3180_p3 }
  0x11   :  { %3190 = shalt.err (!%p3187_p7)
}
  0x12   :  { %s3288_s28 = smov 512   ;;  %s3289_s29 = smov 32  }
  0x13   :  { %35 = dma.hbm_to_vmem [thread:$0]  %s3450_s1, 4096, %s30_s19, [#allocation6], %s3288_s28, %s3288_s28, %s3289_s29  }
  0x14   :  { %s3290_s7 = smov [#allocation2]   ;;  %s3291_s9 = smov [#allocation7]  }
  0x15   :  { %s20_s8 = sshll.u32 %s3290_s7, 4  ;;  %s42_s10 = sshll.u32 %s3291_s9, 4  ;;  %s21_s8 = int_to_ptr.vmem [resolvable:$true] %s20_s8  ;;  %s43_s10 = int_to_ptr.vmem [resolvable:$true] %s42_s10 }
  0x16   :  { %s3191_s13 = scalar_lea.hbm %s3449_s0, 64 }
  0x17   :  { %p3192_p8 = scmp.ne.s32.totalorder %s3449_s0, %s3191_s13  ;;  %p3195_p9 = scmp.lt.u32.totalorder %s3191_s13, %s3449_s0 }
  0x19   :  { %p3197_p10 = pnand %p3195_p9, %p3192_p8 }
  0x1b   :  { %3200 = shalt.err (!%p3197_p10)
}
  0x1c   :  { %s3201_s1 = scalar_lea.vmem %s21_s8, 64  ;;  %p3206_p12 = scmp.lt.s32.totalorder %s21_s8, %s21_s8 }
  0x1d   :  { %p3202_p11 = scmp.ne.s32.totalorder %s21_s8, %s3201_s1  ;;  %p3207_p13 = scmp.lt.s32.totalorder %s3201_s1, %s3201_s1 }
  0x1f   :  { %p3208_p0 = por %p3207_p13, %p3206_p12 }
  0x21   :  { %p3209_p1 = pnand %p3208_p0, %p3202_p11 }
  0x23   :  { %3212 = shalt.err (!%p3209_p1)
}
  0x24   :  { %23 = dma.hbm_to_vmem [thread:$0]  %s3449_s0, 64, %s21_s8, [#allocation3]  }
  0x25   :  { %s3213_s22 = scalar_lea.hbm %s3451_s2, 128 }
  0x26   :  { %p3214_p2 = scmp.ne.s32.totalorder %s3451_s2, %s3213_s22  ;;  %p3217_p3 = scmp.lt.u32.totalorder %s3213_s22, %s3451_s2 }
  0x28   :  { %p3219_p4 = pnand %p3217_p3, %p3214_p2 }
  0x2a   :  { %3222 = shalt.err (!%p3219_p4)
}
  0x2b   :  { %s3223_s27 = scalar_lea.vmem %s43_s10, 128  ;;  %p3228_p6 = scmp.lt.s32.totalorder %s43_s10, %s43_s10 }
  0x2c   :  { %p3224_p5 = scmp.ne.s32.totalorder %s43_s10, %s3223_s27  ;;  %p3229_p7 = scmp.lt.s32.totalorder %s3223_s27, %s3223_s27 }
  0x2e   :  { %p3230_p8 = por %p3229_p7, %p3228_p6 }
  0x30   :  { %p3231_p9 = pnand %p3230_p8, %p3224_p5 }
  0x32   :  { %3234 = shalt.err (!%p3231_p9)
}
  0x33   :  { %45 = dma.hbm_to_vmem [thread:$0]  %s3451_s2, 128, %s43_s10, [#allocation6]  }
  0x34   :  { %s3292_s29 = smov [#allocation8]   ;;  %s3235_s8 = scalar_lea.hbm %s3452_s3, 32768 }
  0x35   :  { %s51_s30 = sshll.u32 %s3292_s29, 4  ;;  %p3236_p10 = scmp.ne.s32.totalorder %s3452_s3, %s3235_s8  ;;  %s52_s30 = int_to_ptr.vmem [resolvable:$true] %s51_s30 }
  0x36   :  { %p3239_p11 = scmp.lt.u32.totalorder %s3235_s8, %s3452_s3 }
  0x38   :  { %p3241_p12 = pnand %p3239_p11, %p3236_p10 }
  0x3a   :  { %3244 = shalt.err (!%p3241_p12)
}
  0x3b   :  { %s3245_s14 = scalar_lea.vmem %s52_s30, 32768  ;;  %p3250_p0 = scmp.lt.s32.totalorder %s52_s30, %s52_s30 }
  0x3c   :  { %p3246_p13 = scmp.ne.s32.totalorder %s52_s30, %s3245_s14  ;;  %p3251_p1 = scmp.lt.s32.totalorder %s3245_s14, %s3245_s14 }
  0x3e   :  { %p3252_p2 = por %p3251_p1, %p3250_p0 }
  0x40   :  { %p3253_p3 = pnand %p3252_p2, %p3246_p13 }
  0x42   :  { %3256 = shalt.err (!%p3253_p3)
}
  0x43   :  { %s3293_s2 = smov 256   ;;  %s3294_s10 = smov 16  }
  0x44   :  { %57 = dma.hbm_to_vmem [thread:$0]  %s3452_s3, 32768, %s52_s30, [#allocation9], %s3293_s2, %s3293_s2, %s3294_s10  }
  0x45   :  { %3279 = dma.done.wait [#allocation3], 64  }
  0x46   :  { %3280 = vsyncadd [#allocation3], 4294967232 }
  0x47   :  { %3281 = dma.done.wait [#allocation6], 4224  }
  0x48   :  { %3282 = vsyncadd [#allocation6], 4294963072 }
  0x49   :  { %3283 = dma.done.wait [#allocation9], 32768  }
  0x4a   :  { %3284 = vsyncadd [#allocation9], 4294934528  ;;  %v3295_v0 = vmov 0   ;;  %v74_v1 = vld [vmem:[#allocation5] sm:$0xff]  ;;  %v75_v10 = vld [vmem:[#allocation5 + $0x8] sm:$0xff]  ;;  %vm308_vm0 = vcmask 523264  }
  0x4b   :  { %344 = vmatprep.mubr.bf16.mxu0 %v3295_v0  ;;  %385 = vmatprep.mubr.bf16.mxu1 %v3295_v0  ;;  %v78_v2 = vld [vmem:[#allocation5 + $0x20] sm:$0xff]  ;;  %v79_v11 = vld [vmem:[#allocation5 + $0x28] sm:$0xff]  ;;  %v76_v29 = vld [vmem:[#allocation5 + $0x10] sm:$0xff] }
  0x4c   :  { %v82_v3 = vld [vmem:[#allocation5 + $0x40] sm:$0xff]  ;;  %v2440_v4 = vcombine.high %v74_v1, %v78_v2  ;;  %v2439_v5 = vcombine.low %v74_v1, %v78_v2  ;;  %v83_v12 = vld [vmem:[#allocation5 + $0x48] sm:$0xff]  ;;  %v2442_v14 = vcombine.high %v75_v10, %v79_v11  ;;  %v2441_v15 = vcombine.low %v75_v10, %v79_v11  ;;  %v80_v30 = vld [vmem:[#allocation5 + $0x30] sm:$0xff] }
  0x4d   :  { %v86_v6 = vld [vmem:[#allocation5 + $0x60] sm:$0xff]  ;;  %v87_v16 = vld [vmem:[#allocation5 + $0x68] sm:$0xff]  ;;  %v2444_v34 = vcombine.high %v76_v29, %v80_v30  ;;  %v84_v35 = vld [vmem:[#allocation5 + $0x50] sm:$0xff]  ;;  %v2443_v41 = vcombine.low %v76_v29, %v80_v30 }
  0x4e   :  { %v2448_v7 = vcombine.high %v82_v3, %v86_v6  ;;  %v90_v8 = vld [vmem:[#allocation5 + $0x80] sm:$0xff]  ;;  %312 = vmatprep.subr.bf16.mxu0 %v2440_v4  ;;  %v2447_v13 = vcombine.low %v82_v3, %v86_v6  ;;  %v2450_v18 = vcombine.high %v83_v12, %v87_v16  ;;  %v91_v19 = vld [vmem:[#allocation5 + $0x88] sm:$0xff]  ;;  %353 = vmatprep.subr.bf16.mxu1 %v2442_v14  ;;  %v88_v36 = vld [vmem:[#allocation5 + $0x70] sm:$0xff] }
  0x4f   :  { %v94_v9 = vld [vmem:[#allocation5 + $0xa0] sm:$0xff]  ;;  %313 = vmatpush1.bf16.msra.mxu0 %v2439_v5  ;;  %v95_v20 = vld [vmem:[#allocation5 + $0xa8] sm:$0xff]  ;;  %354 = vmatpush1.bf16.msra.mxu1 %v2441_v15  ;;  %v2449_v23 = vcombine.low %v83_v12, %v87_v16  ;;  %v77_v37 = vld [vmem:[#allocation5 + $0x18] sm:$0xff]  ;;  %v2452_v42 = vcombine.high %v84_v35, %v88_v36  ;;  %v2451_v49 = vcombine.low %v84_v35, %v88_v36 }
  0x50   :  { %314 = vmatprep.subr.bf16.mxu0 %v2448_v7  ;;  %v2456_v17 = vcombine.high %v90_v8, %v94_v9  ;;  %v98_v21 = vld [vmem:[#allocation5 + $0xc0] sm:$0xff]  ;;  %v2455_v24 = vcombine.low %v90_v8, %v94_v9  ;;  %355 = vmatprep.subr.bf16.mxu1 %v2450_v18  ;;  %v2458_v25 = vcombine.high %v91_v19, %v95_v20  ;;  %v99_v27 = vld [vmem:[#allocation5 + $0xc8] sm:$0xff]  ;;  %v81_v38 = vld [vmem:[#allocation5 + $0x38] sm:$0xff] }
  0x51   :  { %v102_v22 = vld [vmem:[#allocation5 + $0xe0] sm:$0xff]  ;;  %v103_v28 = vld [vmem:[#allocation5 + $0xe8] sm:$0xff]  ;;  %v2457_v31 = vcombine.low %v91_v19, %v95_v20  ;;  %v73_v40 = vld [vmem:[#allocation2] sm:$0xf]  ;;  %v2446_v43 = vcombine.high %v77_v37, %v81_v38  ;;  %v2445_v48 = vcombine.low %v77_v37, %v81_v38 }
  0x52   :  { %v2464_v26 = vcombine.high %v98_v21, %v102_v22  ;;  %v2463_v32 = vcombine.low %v98_v21, %v102_v22  ;;  %v2466_v33 = vcombine.high %v99_v27, %v103_v28  ;;  %v2465_v39 = vcombine.low %v99_v27, %v103_v28  ;;  %v85_v44 = vld [vmem:[#allocation5 + $0x58] sm:$0xff]  ;;  %v92_v46 = vld [vmem:[#allocation5 + $0x90] sm:$0xff] }
  0x53   :  { %315 = vmatpush1.bf16.msra.mxu0 %v2447_v13  ;;  %356 = vmatpush1.bf16.msra.mxu1 %v2449_v23  ;;  %v89_v45 = vld [vmem:[#allocation5 + $0x78] sm:$0xff]  ;;  %v96_v47 = vld [vmem:[#allocation5 + $0xb0] sm:$0xff] }
  0x54   :  { %316 = vmatprep.subr.bf16.mxu0 %v2456_v17  ;;  %357 = vmatprep.subr.bf16.mxu1 %v2458_v25  ;;  %v2454_v50 = vcombine.high %v85_v44, %v89_v45  ;;  %v2460_v51 = vcombine.high %v92_v46, %v96_v47  ;;  %v93_v52 = vld [vmem:[#allocation5 + $0x98] sm:$0xff]  ;;  %v100_v54 = vld [vmem:[#allocation5 + $0xd0] sm:$0xff]  ;;  %v2453_v56 = vcombine.low %v85_v44, %v89_v45 }
  0x55   :  { %v97_v53 = vld [vmem:[#allocation5 + $0xb8] sm:$0xff]  ;;  %v104_v55 = vld [vmem:[#allocation5 + $0xf0] sm:$0xff]  ;;  %v2459_v57 = vcombine.low %v92_v46, %v96_v47 }
  0x56   :  { %v2462_v58 = vcombine.high %v93_v52, %v97_v53  ;;  %v2468_v59 = vcombine.high %v100_v54, %v104_v55  ;;  %v101_v60 = vld [vmem:[#allocation5 + $0xd8] sm:$0xff]  ;;  %v2461_v62 = vcombine.low %v93_v52, %v97_v53  ;;  %v2467_v63 = vcombine.low %v100_v54, %v104_v55  ;;  %v2772_v6 = vld [vmem:[#allocation8 + $0x8] ss:$16 sps:$4 sm:$0xff]   ;;  %v2780_v8 = vld [vmem:[#allocation8 + $0x2c] ss:$16 sps:$4 sm:$0xff]  }
  0x57   :  { %317 = vmatpush1.bf16.msra.mxu0 %v2455_v24  ;;  %358 = vmatpush1.bf16.msra.mxu1 %v2457_v31  ;;  %v105_v61 = vld [vmem:[#allocation5 + $0xf8] sm:$0xff]  ;;  %v2778_v10 = vld [vmem:[#allocation8 + $0x28] ss:$16 sps:$4 sm:$0xff]   ;;  %v2786_v12 = vld [vmem:[#allocation8 + $0x4c] ss:$16 sps:$4 sm:$0xff]  }
  0x58   :  { %318 = vmatprep.subr.bf16.mxu0 %v2464_v26  ;;  %359 = vmatprep.subr.bf16.mxu1 %v2466_v33  ;;  %v2470_v1 = vcombine.high %v101_v60, %v105_v61  ;;  %v2771_v2 = vld [vmem:[#allocation8 + $0x4] ss:$16 sps:$4 sm:$0xff]   ;;  %v2469_v3 = vcombine.low %v101_v60, %v105_v61  ;;  %v2769_v4 = vld [vmem:[#allocation8] ss:$16 sps:$4 sm:$0xff]   ;;  %v2784_v14 = vld [vmem:[#allocation8 + $0x48] ss:$16 sps:$4 sm:$0xff]  }
  0x59   :  { %v2777_v5 = vld [vmem:[#allocation8 + $0x24] ss:$16 sps:$4 sm:$0xff]   ;;  %v2775_v7 = vld [vmem:[#allocation8 + $0x20] ss:$16 sps:$4 sm:$0xff]   ;;  %v2792_v16 = vld [vmem:[#allocation8 + $0x6c] ss:$16 sps:$4 sm:$0xff]  }
  0x5a   :  { %v2783_v9 = vld [vmem:[#allocation8 + $0x44] ss:$16 sps:$4 sm:$0xff]   ;;  %v2781_v11 = vld [vmem:[#allocation8 + $0x40] ss:$16 sps:$4 sm:$0xff]   ;;  %v2790_v18 = vld [vmem:[#allocation8 + $0x68] ss:$16 sps:$4 sm:$0xff]  }
  0x5b   :  { %319 = vmatpush1.bf16.msra.mxu0 %v2463_v32  ;;  %360 = vmatpush1.bf16.msra.mxu1 %v2465_v39  ;;  %v2789_v13 = vld [vmem:[#allocation8 + $0x64] ss:$16 sps:$4 sm:$0xff]   ;;  %v2787_v15 = vld [vmem:[#allocation8 + $0x60] ss:$16 sps:$4 sm:$0xff]   ;;  %v2798_v20 = vld [vmem:[#allocation8 + $0x8c] ss:$16 sps:$4 sm:$0xff]  }
  0x5c   :  { %394 = vmatprep.subr.bf16.mxu0 %v2444_v34  ;;  %435 = vmatprep.subr.bf16.mxu1 %v2446_v43  ;;  %v2795_v17 = vld [vmem:[#allocation8 + $0x84] ss:$16 sps:$4 sm:$0xff]   ;;  %v2793_v19 = vld [vmem:[#allocation8 + $0x80] ss:$16 sps:$4 sm:$0xff]   ;;  %v2796_v22 = vld [vmem:[#allocation8 + $0x88] ss:$16 sps:$4 sm:$0xff]  }
  0x5d   :  { %v2801_v21 = vld [vmem:[#allocation8 + $0xa4] ss:$16 sps:$4 sm:$0xff]   ;;  %v2799_v23 = vld [vmem:[#allocation8 + $0xa0] ss:$16 sps:$4 sm:$0xff]   ;;  %v2804_v24 = vld [vmem:[#allocation8 + $0xac] ss:$16 sps:$4 sm:$0xff]  }
  0x5e   :  { %2471 = vmatmul.mubr.msk.bf16.vlgmr.msra.gmra.mrb[0].mxu0 %vm308_vm0, %v73_v40  ;;  %2472 = vmatmul.mubr.msk.bf16.vlgmr.msra.gmra.mrb[0].mxu1 %vm308_vm0, %v73_v40  ;;  %v2807_v25 = vld [vmem:[#allocation8 + $0xc4] ss:$16 sps:$4 sm:$0xff]   ;;  %v2802_v26 = vld [vmem:[#allocation8 + $0xa8] ss:$16 sps:$4 sm:$0xff]   ;;  %v2805_v27 = vld [vmem:[#allocation8 + $0xc0] ss:$16 sps:$4 sm:$0xff]  }
  0x5f   :  { %395 = vmatpush1.bf16.msra.mxu0 %v2443_v41  ;;  %426 = vmatprep.mubr.bf16.mxu0 %v3295_v0  ;;  %v2810_v28 = vld [vmem:[#allocation8 + $0xcc] ss:$16 sps:$4 sm:$0xff]   ;;  %v2813_v29 = vld [vmem:[#allocation8 + $0xe4] ss:$16 sps:$4 sm:$0xff]   ;;  %v2808_v30 = vld [vmem:[#allocation8 + $0xc8] ss:$16 sps:$4 sm:$0xff]  }
  0x60   :  { %396 = vmatprep.subr.bf16.mxu0 %v2452_v42  ;;  %436 = vmatpush1.bf16.msra.mxu1 %v2445_v48  ;;  %v2811_v31 = vld [vmem:[#allocation8 + $0xe0] ss:$16 sps:$4 sm:$0xff]   ;;  %v2816_v32 = vld [vmem:[#allocation8 + $0xec] ss:$16 sps:$4 sm:$0xff]   ;;  %v2819_v33 = vld [vmem:[#allocation8 + $0x104] ss:$16 sps:$4 sm:$0xff]  }
  0x61   :  { %467 = vmatprep.mubr.bf16.mxu1 %v3295_v0  ;;  %437 = vmatprep.subr.bf16.mxu1 %v2454_v50  ;;  %v2774_v0 = vld [vmem:[#allocation8 + $0xc] ss:$16 sps:$4 sm:$0xff]   ;;  %v2814_v34 = vld [vmem:[#allocation8 + $0xe8] ss:$16 sps:$4 sm:$0xff]   ;;  %v2817_v35 = vld [vmem:[#allocation8 + $0x100] ss:$16 sps:$4 sm:$0xff]  }
  0x62   :  { %v2822_v36 = vld [vmem:[#allocation8 + $0x10c] ss:$16 sps:$4 sm:$0xff]   ;;  %v2825_v37 = vld [vmem:[#allocation8 + $0x124] ss:$16 sps:$4 sm:$0xff]   ;;  %v2820_v38 = vld [vmem:[#allocation8 + $0x108] ss:$16 sps:$4 sm:$0xff]  }
  0x63   :  { %397 = vmatpush1.bf16.msra.mxu0 %v2451_v49  ;;  %v2823_v39 = vld [vmem:[#allocation8 + $0x120] ss:$16 sps:$4 sm:$0xff]   ;;  %v2831_v41 = vld [vmem:[#allocation8 + $0x144] ss:$16 sps:$4 sm:$0xff]   ;;  %v2826_v42 = vld [vmem:[#allocation8 + $0x128] ss:$16 sps:$4 sm:$0xff]  }
  0x64   :  { %398 = vmatprep.subr.bf16.mxu0 %v2460_v51  ;;  %438 = vmatpush1.bf16.msra.mxu1 %v2453_v56  ;;  %v2829_v43 = vld [vmem:[#allocation8 + $0x140] ss:$16 sps:$4 sm:$0xff]   ;;  %v2834_v44 = vld [vmem:[#allocation8 + $0x14c] ss:$16 sps:$4 sm:$0xff]   ;;  %v2837_v45 = vld [vmem:[#allocation8 + $0x164] ss:$16 sps:$4 sm:$0xff]  }
  0x65   :  { %439 = vmatprep.subr.bf16.mxu1 %v2462_v58  ;;  %v2832_v46 = vld [vmem:[#allocation8 + $0x148] ss:$16 sps:$4 sm:$0xff]   ;;  %v2835_v47 = vld [vmem:[#allocation8 + $0x160] ss:$16 sps:$4 sm:$0xff]   ;;  %v2840_v48 = vld [vmem:[#allocation8 + $0x16c] ss:$16 sps:$4 sm:$0xff]  }
  0x66   :  { %v2843_v49 = vld [vmem:[#allocation8 + $0x184] ss:$16 sps:$4 sm:$0xff]   ;;  %v2838_v50 = vld [vmem:[#allocation8 + $0x168] ss:$16 sps:$4 sm:$0xff]   ;;  %v2841_v51 = vld [vmem:[#allocation8 + $0x180] ss:$16 sps:$4 sm:$0xff]  }
  0x67   :  { %399 = vmatpush1.bf16.msra.mxu0 %v2459_v57  ;;  %v2846_v52 = vld [vmem:[#allocation8 + $0x18c] ss:$16 sps:$4 sm:$0xff]   ;;  %v2849_v53 = vld [vmem:[#allocation8 + $0x1a4] ss:$16 sps:$4 sm:$0xff]   ;;  %v2844_v54 = vld [vmem:[#allocation8 + $0x188] ss:$16 sps:$4 sm:$0xff]  }
  0x68   :  { %400 = vmatprep.subr.bf16.mxu0 %v2468_v59  ;;  %440 = vmatpush1.bf16.msra.mxu1 %v2461_v62  ;;  %v2847_v55 = vld [vmem:[#allocation8 + $0x1a0] ss:$16 sps:$4 sm:$0xff]   ;;  %v2852_v56 = vld [vmem:[#allocation8 + $0x1ac] ss:$16 sps:$4 sm:$0xff]   ;;  %v2850_v57 = vld [vmem:[#allocation8 + $0x1a8] ss:$16 sps:$4 sm:$0xff]  }
  0x69   :  { %441 = vmatprep.subr.bf16.mxu1 %v2470_v1  ;;  %v2855_v58 = vld [vmem:[#allocation8 + $0x1c4] ss:$16 sps:$4 sm:$0xff]   ;;  %v2858_v59 = vld [vmem:[#allocation8 + $0x1cc] ss:$16 sps:$4 sm:$0xff]   ;;  %v2853_v60 = vld [vmem:[#allocation8 + $0x1c0] ss:$16 sps:$4 sm:$0xff]  }
  0x6a   :  { %v2856_v61 = vld [vmem:[#allocation8 + $0x1c8] ss:$16 sps:$4 sm:$0xff]   ;;  %v2861_v62 = vld [vmem:[#allocation8 + $0x1e4] ss:$16 sps:$4 sm:$0xff]   ;;  %v2859_v1 = vld [vmem:[#allocation8 + $0x1e0] ss:$16 sps:$4 sm:$0xff]  }
  0x6b   :  { %401 = vmatpush1.bf16.msra.mxu0 %v2467_v63  ;;  %v2864_v63 = vld [vmem:[#allocation8 + $0x1ec] ss:$16 sps:$4 sm:$0xff]  }
  0x6c   :  { %2050 = vmatprep.subr.bf16.mxu0 %v2771_v2  ;;  %442 = vmatpush1.bf16.msra.mxu1 %v2469_v3  ;;  %v2862_v2 = vld [vmem:[#allocation8 + $0x1e8] ss:$16 sps:$4 sm:$0xff]   ;;  %v2867_v3 = vld [vmem:[#allocation8 + $0x204] ss:$16 sps:$4 sm:$0xff]  }
  0x6d   :  { %2214 = vmatprep.subr.bf16.mxu1 %v2774_v0  ;;  %v108_v0 = vlaneseq }
  0x6e   :  { %2473 = vmatmul.mubr.msk.bf16.vlgmr.msra.gmra.mrb[4].mxu0 %vm308_vm0, %v73_v40 }
  0x6f   :  { %2051 = vmatpush1.bf16.msra.mxu0 %v2769_v4  ;;  %2474 = vmatmul.mubr.msk.bf16.vlgmr.msra.gmra.mrb[4].mxu1 %vm308_vm0, %v73_v40  ;;  %v2828_v40 = vld [vmem:[#allocation8 + $0x12c] ss:$16 sps:$4 sm:$0xff]  }
  0x70   :  { %2052 = vmatprep.subr.bf16.mxu0 %v2777_v5  ;;  %2215 = vmatpush1.bf16.msra.mxu1 %v2772_v6  ;;  %v2870_v4 = vld [vmem:[#allocation8 + $0x20c] ss:$16 sps:$4 sm:$0xff]   ;;  %v3383_v5 = vshrl.u32 %v108_v0, 7  ;;  %v2915_v0 = vld [vmem:[#allocation8 + $0x304] ss:$16 sps:$4 sm:$0xff]  }
  0x71   :  { %2216 = vmatprep.subr.bf16.mxu1 %v2780_v8 }
  0x72   :  { %v110_v6 = vsub.s32 0, %v3383_v5  ;;  %v114_v8 = vsub.s32 1, %v3383_v5 }
  0x73   :  { %2053 = vmatpush1.bf16.msra.mxu0 %v2775_v7  ;;  %v3386_v7 = vld [vmem:[#allocation7] sm:$0xff] }
  0x74   :  { %2054 = vmatprep.subr.bf16.mxu0 %v2783_v9  ;;  %2217 = vmatpush1.bf16.msra.mxu1 %v2778_v10  ;;  %v111_v9 = vrot.slane %v3386_v7, %v110_v6  ;;  %v122_v10 = vsub.s32 3, %v3383_v5 }
  0x75   :  { %2218 = vmatprep.subr.bf16.mxu1 %v2786_v12 }
  0x77   :  { %2055 = vmatpush1.bf16.msra.mxu0 %v2781_v11  ;;  %v115_v11 = vrot.slane %v3386_v7, %v114_v8 }
  0x78   :  { %2056 = vmatprep.subr.bf16.mxu0 %v2789_v13  ;;  %2219 = vmatpush1.bf16.msra.mxu1 %v2784_v14 }
  0x79   :  { %2220 = vmatprep.subr.bf16.mxu1 %v2792_v16 }
  0x7b   :  { %2057 = vmatpush1.bf16.msra.mxu0 %v2787_v15  ;;  %v123_v15 = vrot.slane %v3386_v7, %v122_v10 }
  0x7c   :  { %2058 = vmatprep.subr.bf16.mxu0 %v2795_v17  ;;  %2221 = vmatpush1.bf16.msra.mxu1 %v2790_v18 }
  0x7d   :  { %2222 = vmatprep.subr.bf16.mxu1 %v2798_v20 }
  0x7f   :  { %2059 = vmatpush1.bf16.msra.mxu0 %v2793_v19 }
  0x80   :  { %2060 = vmatprep.subr.bf16.mxu0 %v2801_v21  ;;  %2223 = vmatpush1.bf16.msra.mxu1 %v2796_v22 }
  0x81   :  { %2224 = vmatprep.subr.bf16.mxu1 %v2804_v24 }
  0x83   :  { %2061 = vmatpush1.bf16.msra.mxu0 %v2799_v23 }
  0x84   :  { %2062 = vmatprep.subr.bf16.mxu0 %v2807_v25  ;;  %2225 = vmatpush1.bf16.msra.mxu1 %v2802_v26  ;;  %v2865_v26 = vld [vmem:[#allocation8 + $0x200] ss:$16 sps:$4 sm:$0xff]  }
  0x85   :  { %2226 = vmatprep.subr.bf16.mxu1 %v2810_v28 }
  0x87   :  { %2063 = vmatpush1.bf16.msra.mxu0 %v2805_v27  ;;  %v2868_v27 = vld [vmem:[#allocation8 + $0x208] ss:$16 sps:$4 sm:$0xff]  }
  0x88   :  { %2064 = vmatprep.subr.bf16.mxu0 %v2813_v29  ;;  %2227 = vmatpush1.bf16.msra.mxu1 %v2808_v30  ;;  %v2873_v30 = vld [vmem:[#allocation8 + $0x224] ss:$16 sps:$4 sm:$0xff]  }
  0x89   :  { %2228 = vmatprep.subr.bf16.mxu1 %v2816_v32 }
  0x8b   :  { %2065 = vmatpush1.bf16.msra.mxu0 %v2811_v31  ;;  %v2876_v31 = vld [vmem:[#allocation8 + $0x22c] ss:$16 sps:$4 sm:$0xff]  }
  0x8c   :  { %2066 = vmatprep.subr.bf16.mxu0 %v2819_v33  ;;  %2229 = vmatpush1.bf16.msra.mxu1 %v2814_v34  ;;  %v2871_v34 = vld [vmem:[#allocation8 + $0x220] ss:$16 sps:$4 sm:$0xff]  }
  0x8d   :  { %2230 = vmatprep.subr.bf16.mxu1 %v2822_v36  ;;  %v2879_v36 = vld [vmem:[#allocation8 + $0x244] ss:$16 sps:$4 sm:$0xff]  }
  0x8f   :  { %2067 = vmatpush1.bf16.msra.mxu0 %v2817_v35  ;;  %v2874_v35 = vld [vmem:[#allocation8 + $0x228] ss:$16 sps:$4 sm:$0xff]  }
  0x90   :  { %2068 = vmatprep.subr.bf16.mxu0 %v2825_v37  ;;  %2231 = vmatpush1.bf16.msra.mxu1 %v2820_v38  ;;  %v2882_v37 = vld [vmem:[#allocation8 + $0x24c] ss:$16 sps:$4 sm:$0xff]   ;;  %v2877_v38 = vld [vmem:[#allocation8 + $0x240] ss:$16 sps:$4 sm:$0xff]  }
  0x91   :  { %2232 = vmatprep.subr.bf16.mxu1 %v2828_v40  ;;  %v2885_v40 = vld [vmem:[#allocation8 + $0x264] ss:$16 sps:$4 sm:$0xff]  }
  0x93   :  { %2069 = vmatpush1.bf16.msra.mxu0 %v2823_v39  ;;  %v2880_v39 = vld [vmem:[#allocation8 + $0x248] ss:$16 sps:$4 sm:$0xff]  }
  0x94   :  { %2070 = vmatprep.subr.bf16.mxu0 %v2831_v41  ;;  %2233 = vmatpush1.bf16.msra.mxu1 %v2826_v42  ;;  %v2888_v41 = vld [vmem:[#allocation8 + $0x26c] ss:$16 sps:$4 sm:$0xff]  }
  0x95   :  { %2234 = vmatprep.subr.bf16.mxu1 %v2834_v44  ;;  %v2883_v44 = vld [vmem:[#allocation8 + $0x260] ss:$16 sps:$4 sm:$0xff]  }
  0x97   :  { %2071 = vmatpush1.bf16.msra.mxu0 %v2829_v43 }
  0x98   :  { %2072 = vmatprep.subr.bf16.mxu0 %v2837_v45  ;;  %2235 = vmatpush1.bf16.msra.mxu1 %v2832_v46  ;;  %v2886_v45 = vld [vmem:[#allocation8 + $0x268] ss:$16 sps:$4 sm:$0xff]  }
  0x99   :  { %2236 = vmatprep.subr.bf16.mxu1 %v2840_v48  ;;  %v2894_v48 = vld [vmem:[#allocation8 + $0x28c] ss:$16 sps:$4 sm:$0xff]  }
  0x9b   :  { %2073 = vmatpush1.bf16.msra.mxu0 %v2835_v47  ;;  %v2891_v47 = vld [vmem:[#allocation8 + $0x284] ss:$16 sps:$4 sm:$0xff]  }
  0x9c   :  { %2074 = vmatprep.subr.bf16.mxu0 %v2843_v49  ;;  %2237 = vmatpush1.bf16.msra.mxu1 %v2838_v50  ;;  %v2889_v50 = vld [vmem:[#allocation8 + $0x280] ss:$16 sps:$4 sm:$0xff]  }
  0x9d   :  { %2238 = vmatprep.subr.bf16.mxu1 %v2846_v52  ;;  %v2897_v52 = vld [vmem:[#allocation8 + $0x2a4] ss:$16 sps:$4 sm:$0xff]  }
  0x9f   :  { %2075 = vmatpush1.bf16.msra.mxu0 %v2841_v51  ;;  %v2892_v51 = vld [vmem:[#allocation8 + $0x288] ss:$16 sps:$4 sm:$0xff]  }
  0xa0   :  { %2076 = vmatprep.subr.bf16.mxu0 %v2849_v53  ;;  %2239 = vmatpush1.bf16.msra.mxu1 %v2844_v54  ;;  %v2900_v53 = vld [vmem:[#allocation8 + $0x2ac] ss:$16 sps:$4 sm:$0xff]   ;;  %v2895_v54 = vld [vmem:[#allocation8 + $0x2a0] ss:$16 sps:$4 sm:$0xff]  }
  0xa1   :  { %2240 = vmatprep.subr.bf16.mxu1 %v2852_v56  ;;  %v2903_v56 = vld [vmem:[#allocation8 + $0x2c4] ss:$16 sps:$4 sm:$0xff]  }
  0xa3   :  { %2077 = vmatpush1.bf16.msra.mxu0 %v2847_v55  ;;  %v2898_v55 = vld [vmem:[#allocation8 + $0x2a8] ss:$16 sps:$4 sm:$0xff]  }
  0xa4   :  { %2241 = vmatpush1.bf16.msra.mxu1 %v2850_v57  ;;  %2078 = vmatprep.subr.bf16.mxu0 %v2855_v58  ;;  %v2906_v57 = vld [vmem:[#allocation8 + $0x2cc] ss:$16 sps:$4 sm:$0xff]  }
  0xa5   :  { %2242 = vmatprep.subr.bf16.mxu1 %v2858_v59  ;;  %v2901_v59 = vld [vmem:[#allocation8 + $0x2c0] ss:$16 sps:$4 sm:$0xff]  }
  0xa7   :  { %2079 = vmatpush1.bf16.msra.mxu0 %v2853_v60  ;;  %v2904_v60 = vld [vmem:[#allocation8 + $0x2c8] ss:$16 sps:$4 sm:$0xff]  }
  0xa8   :  { %2243 = vmatpush1.bf16.msra.mxu1 %v2856_v61  ;;  %2080 = vmatprep.subr.bf16.mxu0 %v2861_v62  ;;  %v2909_v62 = vld [vmem:[#allocation8 + $0x2e4] ss:$16 sps:$4 sm:$0xff]  }
  0xa9   :  { %2244 = vmatprep.subr.bf16.mxu1 %v2864_v63  ;;  %v2912_v63 = vld [vmem:[#allocation8 + $0x2ec] ss:$16 sps:$4 sm:$0xff]  }
  0xab   :  { %2081 = vmatpush1.bf16.msra.mxu0 %v2859_v1 }
  0xac   :  { %2245 = vmatpush1.bf16.msra.mxu1 %v2862_v2  ;;  %2091 = vmatprep.subr.bf16.mxu0 %v2867_v3  ;;  %v2907_v3 = vld [vmem:[#allocation8 + $0x2e0] ss:$16 sps:$4 sm:$0xff]  }
  0xad   :  { %2255 = vmatprep.subr.bf16.mxu1 %v2870_v4  ;;  %v2910_v4 = vld [vmem:[#allocation8 + $0x2e8] ss:$16 sps:$4 sm:$0xff]  }
 0x131   :  { %v346_v12 = vpop.f32.mrb[0].mxu0  ;;  %v3399_v20 = vpop.f32.mrb[0].mxu1 }
 0x132   :  { %v347_v13 = vadd.f32 %v346_v12, %v111_v9  ;;  %v348_v14 = vpop.f32.mrb[1].mxu0  ;;  %v389_v22 = vpop.f32.mrb[1].mxu1  ;;  %v2918_v9 = vld [vmem:[#allocation8 + $0x30c] ss:$16 sps:$4 sm:$0xff]   ;;  %v2916_v12 = vld [vmem:[#allocation8 + $0x308] ss:$16 sps:$4 sm:$0xff]  }
 0x133   :  { %v349_v16 = vadd.f32 %v348_v14, %v115_v11  ;;  %v350_v17 = vpop.f32.mrb[2].mxu0  ;;  %v390_v23 = vadd.f32 %v389_v22, %v123_v15  ;;  %v391_v24 = vpop.f32.mrb[2].mxu1  ;;  %v2913_v11 = vld [vmem:[#allocation8 + $0x300] ss:$16 sps:$4 sm:$0xff]   ;;  %v2924_v14 = vld [vmem:[#allocation8 + $0x32c] ss:$16 sps:$4 sm:$0xff]  }
 0x134   :  { %v476_v18 = vmax.f32 %v347_v13, 0.0  ;;  %v351_v19 = vpop.f32.mrb[3].mxu0  ;;  %v392_v28 = vpop.f32.mrb[3].mxu1  ;;  %v2921_v13 = vld [vmem:[#allocation8 + $0x324] ss:$16 sps:$4 sm:$0xff]  }
 0x135   :  { %v477_v21 = vmax.f32 %v349_v16, 0.0  ;;  %v479_v32 = vmax.f32 %v390_v23, 0.0  ;;  %v2919_v15 = vld [vmem:[#allocation8 + $0x320] ss:$16 sps:$4 sm:$0xff]   ;;  %v2922_v16 = vld [vmem:[#allocation8 + $0x328] ss:$16 sps:$4 sm:$0xff]  }
 0x136   :  { %v484_v29 = vpack.c.bf16 %v476_v18, %v476_v18  ;;  %v2927_v17 = vld [vmem:[#allocation8 + $0x344] ss:$16 sps:$4 sm:$0xff]   ;;  %v2930_v18 = vld [vmem:[#allocation8 + $0x34c] ss:$16 sps:$4 sm:$0xff]   ;;  %v2925_v19 = vld [vmem:[#allocation8 + $0x340] ss:$16 sps:$4 sm:$0xff]  }
 0x137   :  { %v485_v25 = vpack.c.bf16 %v477_v21, %v477_v21  ;;  %v487_v33 = vpack.c.bf16 %v479_v32, %v479_v32  ;;  %v2928_v21 = vld [vmem:[#allocation8 + $0x348] ss:$16 sps:$4 sm:$0xff]   ;;  %v2933_v22 = vld [vmem:[#allocation8 + $0x364] ss:$16 sps:$4 sm:$0xff]   ;;  %v2936_v23 = vld [vmem:[#allocation8 + $0x36c] ss:$16 sps:$4 sm:$0xff]  }
 0x138   :  { %v2931_v24 = vld [vmem:[#allocation8 + $0x360] ss:$16 sps:$4 sm:$0xff]   ;;  %v118_v28 = vsub.s32 2, %v3383_v5  ;;  %v2948_v32 = vld [vmem:[#allocation8 + $0x3ac] ss:$16 sps:$4 sm:$0xff]  }
 0x139   :  { %2082 = vmatprep.mubr.bf16.mxu0 %v485_v25  ;;  %2246 = vmatprep.mubr.bf16.mxu1 %v485_v25  ;;  %v2934_v25 = vld [vmem:[#allocation8 + $0x368] ss:$16 sps:$4 sm:$0xff]  }
 0x13a   :  { %2083 = vmatmul.mubr.bf16.vlgmr.msra.gmra.mrb[8].mxu0 %v484_v29  ;;  %2247 = vmatmul.mubr.bf16.vlgmr.msra.gmra.mrb[8].mxu1 %v484_v29  ;;  %v2937_v29 = vld [vmem:[#allocation8 + $0x380] ss:$16 sps:$4 sm:$0xff]  }
 0x13b   :  { %2092 = vmatpush1.bf16.msra.mxu0 %v2865_v26  ;;  %2256 = vmatpush1.bf16.msra.mxu1 %v2868_v27  ;;  %v2939_v26 = vld [vmem:[#allocation8 + $0x384] ss:$16 sps:$4 sm:$0xff]   ;;  %v2942_v27 = vld [vmem:[#allocation8 + $0x38c] ss:$16 sps:$4 sm:$0xff]  }
 0x13c   :  { %2093 = vmatprep.subr.bf16.mxu0 %v2873_v30  ;;  %2257 = vmatprep.subr.bf16.mxu1 %v2876_v31  ;;  %v2940_v30 = vld [vmem:[#allocation8 + $0x388] ss:$16 sps:$4 sm:$0xff]   ;;  %v2945_v31 = vld [vmem:[#allocation8 + $0x3a4] ss:$16 sps:$4 sm:$0xff]  }
 0x13d   :  { %2123 = vmatprep.mubr.bf16.mxu0 %v487_v33  ;;  %2287 = vmatprep.mubr.bf16.mxu1 %v487_v33  ;;  %v130_v33 = vsub.s32 5, %v3383_v5 }
 0x13f   :  { %2094 = vmatpush1.bf16.msra.mxu0 %v2871_v34  ;;  %2258 = vmatpush1.bf16.msra.mxu1 %v2874_v35  ;;  %v119_v34 = vrot.slane %v3386_v7, %v118_v28  ;;  %v2943_v35 = vld [vmem:[#allocation8 + $0x3a0] ss:$16 sps:$4 sm:$0xff]  }
 0x140   :  { %2095 = vmatprep.subr.bf16.mxu0 %v2879_v36  ;;  %2259 = vmatprep.subr.bf16.mxu1 %v2882_v37  ;;  %v2946_v36 = vld [vmem:[#allocation8 + $0x3a8] ss:$16 sps:$4 sm:$0xff]   ;;  %v2951_v37 = vld [vmem:[#allocation8 + $0x3c4] ss:$16 sps:$4 sm:$0xff]  }
 0x141   :  { %v3401_v42 = vpop.f32.mrb[4].mxu0 }
 0x142   :  { %v3403_v43 = vpop.f32.mrb[5].mxu0  ;;  %v3405_v58 = vpop.f32.mrb[4].mxu1 }
 0x143   :  { %2096 = vmatpush1.bf16.msra.mxu0 %v2877_v38  ;;  %2260 = vmatpush1.bf16.msra.mxu1 %v2880_v39  ;;  %v432_v46 = vpop.f32.mrb[6].mxu0  ;;  %v3407_v61 = vpop.f32.mrb[5].mxu1  ;;  %v2954_v38 = vld [vmem:[#allocation8 + $0x3cc] ss:$16 sps:$4 sm:$0xff]   ;;  %v131_v39 = vrot.slane %v3386_v7, %v130_v33  ;;  %v3017_v33 = vld [vmem:[#allocation8 + $0x524] ss:$16 sps:$4 sm:$0xff]  }
 0x144   :  { %2097 = vmatprep.subr.bf16.mxu0 %v2885_v40  ;;  %2261 = vmatprep.subr.bf16.mxu1 %v2888_v41  ;;  %v433_v49 = vpop.f32.mrb[7].mxu0  ;;  %v473_v1 = vpop.f32.mrb[6].mxu1  ;;  %v388_v40 = vadd.f32 %v3399_v20, %v119_v34  ;;  %v2949_v41 = vld [vmem:[#allocation8 + $0x3c0] ss:$16 sps:$4 sm:$0xff]   ;;  %v2960_v46 = vld [vmem:[#allocation8 + $0x3ec] ss:$16 sps:$4 sm:$0xff]  }
 0x145   :  { %v474_v2 = vpop.f32.mrb[7].mxu1  ;;  %v2955_v49 = vld [vmem:[#allocation8 + $0x3e0] ss:$16 sps:$4 sm:$0xff]   ;;  %v3020_v34 = vld [vmem:[#allocation8 + $0x52c] ss:$16 sps:$4 sm:$0xff]  }
 0x146   :  { %v2973_v1 = vld [vmem:[#allocation8 + $0x440] ss:$16 sps:$4 sm:$0xff]   ;;  %v2976_v2 = vld [vmem:[#allocation8 + $0x448] ss:$16 sps:$4 sm:$0xff]  }
 0x147   :  { %2098 = vmatpush1.bf16.msra.mxu0 %v2883_v44  ;;  %2262 = vmatpush1.bf16.msra.mxu1 %v2886_v45  ;;  %v2952_v44 = vld [vmem:[#allocation8 + $0x3c8] ss:$16 sps:$4 sm:$0xff]   ;;  %v2957_v45 = vld [vmem:[#allocation8 + $0x3e4] ss:$16 sps:$4 sm:$0xff]  }
 0x148   :  { %2099 = vmatprep.subr.bf16.mxu0 %v2891_v47  ;;  %2263 = vmatprep.subr.bf16.mxu1 %v2894_v48  ;;  %v431_v47 = vadd.f32 %v3403_v43, %v131_v39  ;;  %v478_v48 = vmax.f32 %v388_v40, 0.0  ;;  %v3021_v39 = vld [vmem:[#allocation8 + $0x540] ss:$16 sps:$4 sm:$0xff]   ;;  %v3024_v40 = vld [vmem:[#allocation8 + $0x548] ss:$16 sps:$4 sm:$0xff]  }
 0x14a   :  { %v481_v20 = vmax.f32 %v431_v47, 0.0  ;;  %v3035_v47 = vld [vmem:[#allocation8 + $0x584] ss:$16 sps:$4 sm:$0xff]  }
 0x14b   :  { %2100 = vmatpush1.bf16.msra.mxu0 %v2889_v50  ;;  %2264 = vmatpush1.bf16.msra.mxu1 %v2892_v51  ;;  %v2958_v50 = vld [vmem:[#allocation8 + $0x3e8] ss:$16 sps:$4 sm:$0xff]   ;;  %v2963_v51 = vld [vmem:[#allocation8 + $0x404] ss:$16 sps:$4 sm:$0xff]  }
 0x14c   :  { %2101 = vmatprep.subr.bf16.mxu0 %v2897_v52  ;;  %2265 = vmatprep.subr.bf16.mxu1 %v2900_v53  ;;  %v2966_v52 = vld [vmem:[#allocation8 + $0x40c] ss:$16 sps:$4 sm:$0xff]   ;;  %v486_v53 = vpack.c.bf16 %v478_v48, %v478_v48  ;;  %v489_v43 = vpack.c.bf16 %v481_v20, %v481_v20 }
 0x14d   :  { %v3038_v48 = vld [vmem:[#allocation8 + $0x58c] ss:$16 sps:$4 sm:$0xff]  }
 0x14e   :  { %v3044_v20 = vld [vmem:[#allocation8 + $0x5ac] ss:$16 sps:$4 sm:$0xff]  }
 0x14f   :  { %2102 = vmatpush1.bf16.msra.mxu0 %v2895_v54  ;;  %2266 = vmatpush1.bf16.msra.mxu1 %v2898_v55  ;;  %v2961_v54 = vld [vmem:[#allocation8 + $0x400] ss:$16 sps:$4 sm:$0xff]   ;;  %v2964_v55 = vld [vmem:[#allocation8 + $0x408] ss:$16 sps:$4 sm:$0xff]  }
 0x150   :  { %2103 = vmatprep.subr.bf16.mxu0 %v2903_v56  ;;  %2267 = vmatprep.subr.bf16.mxu1 %v2906_v57  ;;  %v2969_v56 = vld [vmem:[#allocation8 + $0x424] ss:$16 sps:$4 sm:$0xff]   ;;  %v2972_v57 = vld [vmem:[#allocation8 + $0x42c] ss:$16 sps:$4 sm:$0xff]  }
 0x153   :  { %2104 = vmatpush1.bf16.msra.mxu0 %v2901_v59  ;;  %2268 = vmatpush1.bf16.msra.mxu1 %v2904_v60  ;;  %v2967_v59 = vld [vmem:[#allocation8 + $0x420] ss:$16 sps:$4 sm:$0xff]   ;;  %v2970_v60 = vld [vmem:[#allocation8 + $0x428] ss:$16 sps:$4 sm:$0xff]  }
 0x154   :  { %2105 = vmatprep.subr.bf16.mxu0 %v2909_v62  ;;  %2269 = vmatprep.subr.bf16.mxu1 %v2912_v63  ;;  %v2975_v62 = vld [vmem:[#allocation8 + $0x444] ss:$16 sps:$4 sm:$0xff]   ;;  %v2978_v63 = vld [vmem:[#allocation8 + $0x44c] ss:$16 sps:$4 sm:$0xff]  }
 0x157   :  { %2106 = vmatpush1.bf16.msra.mxu0 %v2907_v3  ;;  %2270 = vmatpush1.bf16.msra.mxu1 %v2910_v4  ;;  %v2981_v3 = vld [vmem:[#allocation8 + $0x464] ss:$16 sps:$4 sm:$0xff]   ;;  %v2984_v4 = vld [vmem:[#allocation8 + $0x46c] ss:$16 sps:$4 sm:$0xff]  }
 0x158   :  { %2107 = vmatprep.subr.bf16.mxu0 %v2915_v0  ;;  %2271 = vmatprep.subr.bf16.mxu1 %v2918_v9  ;;  %v2979_v0 = vld [vmem:[#allocation8 + $0x460] ss:$16 sps:$4 sm:$0xff]   ;;  %v2982_v9 = vld [vmem:[#allocation8 + $0x468] ss:$16 sps:$4 sm:$0xff]  }
 0x15b   :  { %2108 = vmatpush1.bf16.msra.mxu0 %v2913_v11  ;;  %2272 = vmatpush1.bf16.msra.mxu1 %v2916_v12  ;;  %v2987_v11 = vld [vmem:[#allocation8 + $0x484] ss:$16 sps:$4 sm:$0xff]   ;;  %v2990_v12 = vld [vmem:[#allocation8 + $0x48c] ss:$16 sps:$4 sm:$0xff]  }
 0x15c   :  { %2109 = vmatprep.subr.bf16.mxu0 %v2921_v13  ;;  %2273 = vmatprep.subr.bf16.mxu1 %v2924_v14  ;;  %v2985_v13 = vld [vmem:[#allocation8 + $0x480] ss:$16 sps:$4 sm:$0xff]   ;;  %v2988_v14 = vld [vmem:[#allocation8 + $0x488] ss:$16 sps:$4 sm:$0xff]  }
 0x15f   :  { %2110 = vmatpush1.bf16.msra.mxu0 %v2919_v15  ;;  %2274 = vmatpush1.bf16.msra.mxu1 %v2922_v16  ;;  %v2993_v15 = vld [vmem:[#allocation8 + $0x4a4] ss:$16 sps:$4 sm:$0xff]   ;;  %v2996_v16 = vld [vmem:[#allocation8 + $0x4ac] ss:$16 sps:$4 sm:$0xff]  }
 0x160   :  { %2111 = vmatprep.subr.bf16.mxu0 %v2927_v17  ;;  %2275 = vmatprep.subr.bf16.mxu1 %v2930_v18  ;;  %v2991_v17 = vld [vmem:[#allocation8 + $0x4a0] ss:$16 sps:$4 sm:$0xff]   ;;  %v2994_v18 = vld [vmem:[#allocation8 + $0x4a8] ss:$16 sps:$4 sm:$0xff]  }
 0x163   :  { %2112 = vmatpush1.bf16.msra.mxu0 %v2925_v19  ;;  %2276 = vmatpush1.bf16.msra.mxu1 %v2928_v21  ;;  %v2999_v19 = vld [vmem:[#allocation8 + $0x4c4] ss:$16 sps:$4 sm:$0xff]   ;;  %v3002_v21 = vld [vmem:[#allocation8 + $0x4cc] ss:$16 sps:$4 sm:$0xff]  }
 0x164   :  { %2113 = vmatprep.subr.bf16.mxu0 %v2933_v22  ;;  %2277 = vmatprep.subr.bf16.mxu1 %v2936_v23  ;;  %v2997_v22 = vld [vmem:[#allocation8 + $0x4c0] ss:$16 sps:$4 sm:$0xff]   ;;  %v3000_v23 = vld [vmem:[#allocation8 + $0x4c8] ss:$16 sps:$4 sm:$0xff]  }
 0x167   :  { %2114 = vmatpush1.bf16.msra.mxu0 %v2931_v24  ;;  %2278 = vmatpush1.bf16.msra.mxu1 %v2934_v25  ;;  %v3005_v24 = vld [vmem:[#allocation8 + $0x4e4] ss:$16 sps:$4 sm:$0xff]   ;;  %v3008_v25 = vld [vmem:[#allocation8 + $0x4ec] ss:$16 sps:$4 sm:$0xff]  }
 0x168   :  { %2115 = vmatprep.subr.bf16.mxu0 %v2939_v26  ;;  %2279 = vmatprep.subr.bf16.mxu1 %v2942_v27  ;;  %v3003_v26 = vld [vmem:[#allocation8 + $0x4e0] ss:$16 sps:$4 sm:$0xff]   ;;  %v3006_v27 = vld [vmem:[#allocation8 + $0x4e8] ss:$16 sps:$4 sm:$0xff]  }
 0x16b   :  { %2116 = vmatpush1.bf16.msra.mxu0 %v2937_v29  ;;  %2280 = vmatpush1.bf16.msra.mxu1 %v2940_v30  ;;  %v3011_v29 = vld [vmem:[#allocation8 + $0x504] ss:$16 sps:$4 sm:$0xff]   ;;  %v3014_v30 = vld [vmem:[#allocation8 + $0x50c] ss:$16 sps:$4 sm:$0xff]  }
 0x16c   :  { %2117 = vmatprep.subr.bf16.mxu0 %v2945_v31  ;;  %2281 = vmatprep.subr.bf16.mxu1 %v2948_v32  ;;  %v3009_v31 = vld [vmem:[#allocation8 + $0x500] ss:$16 sps:$4 sm:$0xff]   ;;  %v3012_v32 = vld [vmem:[#allocation8 + $0x508] ss:$16 sps:$4 sm:$0xff]  }
 0x16f   :  { %2118 = vmatpush1.bf16.msra.mxu0 %v2943_v35  ;;  %2282 = vmatpush1.bf16.msra.mxu1 %v2946_v36  ;;  %v3015_v35 = vld [vmem:[#allocation8 + $0x520] ss:$16 sps:$4 sm:$0xff]   ;;  %v3018_v36 = vld [vmem:[#allocation8 + $0x528] ss:$16 sps:$4 sm:$0xff]  }
 0x170   :  { %2119 = vmatprep.subr.bf16.mxu0 %v2951_v37  ;;  %2283 = vmatprep.subr.bf16.mxu1 %v2954_v38  ;;  %v3023_v37 = vld [vmem:[#allocation8 + $0x544] ss:$16 sps:$4 sm:$0xff]   ;;  %v3026_v38 = vld [vmem:[#allocation8 + $0x54c] ss:$16 sps:$4 sm:$0xff]  }
 0x173   :  { %2120 = vmatpush1.bf16.msra.mxu0 %v2949_v41  ;;  %2284 = vmatpush1.bf16.msra.mxu1 %v2952_v44  ;;  %v3029_v41 = vld [vmem:[#allocation8 + $0x564] ss:$16 sps:$4 sm:$0xff]   ;;  %v3032_v44 = vld [vmem:[#allocation8 + $0x56c] ss:$16 sps:$4 sm:$0xff]  }
 0x174   :  { %2121 = vmatprep.subr.bf16.mxu0 %v2957_v45  ;;  %2285 = vmatprep.subr.bf16.mxu1 %v2960_v46  ;;  %v3027_v45 = vld [vmem:[#allocation8 + $0x560] ss:$16 sps:$4 sm:$0xff]   ;;  %v3030_v46 = vld [vmem:[#allocation8 + $0x568] ss:$16 sps:$4 sm:$0xff]  }
 0x177   :  { %2122 = vmatpush1.bf16.msra.mxu0 %v2955_v49  ;;  %2286 = vmatpush1.bf16.msra.mxu1 %v2958_v50  ;;  %v126_v49 = vsub.s32 4, %v3383_v5  ;;  %v3033_v50 = vld [vmem:[#allocation8 + $0x580] ss:$16 sps:$4 sm:$0xff]  }
 0x178   :  { %2132 = vmatprep.subr.bf16.mxu0 %v2963_v51  ;;  %2296 = vmatprep.subr.bf16.mxu1 %v2966_v52  ;;  %v3036_v51 = vld [vmem:[#allocation8 + $0x588] ss:$16 sps:$4 sm:$0xff]   ;;  %v3041_v52 = vld [vmem:[#allocation8 + $0x5a4] ss:$16 sps:$4 sm:$0xff]  }
 0x17a   :  { %2124 = vmatmul.mubr.bf16.vlgmr.msra.gmra.mrb[8].mxu0 %v486_v53  ;;  %2288 = vmatmul.mubr.bf16.vlgmr.msra.gmra.mrb[8].mxu1 %v486_v53  ;;  %v138_v53 = vsub.s32 7, %v3383_v5 }
 0x17b   :  { %2133 = vmatpush1.bf16.msra.mxu0 %v2961_v54  ;;  %2297 = vmatpush1.bf16.msra.mxu1 %v2964_v55  ;;  %v127_v54 = vrot.slane %v3386_v7, %v126_v49  ;;  %v3039_v55 = vld [vmem:[#allocation8 + $0x5a0] ss:$16 sps:$4 sm:$0xff]   ;;  %v3110_v49 = vld [vmem:[#allocation8 + $0x70c] ss:$16 sps:$4 sm:$0xff]  }
 0x17c   :  { %2134 = vmatprep.subr.bf16.mxu0 %v2969_v56  ;;  %2298 = vmatprep.subr.bf16.mxu1 %v2972_v57  ;;  %v3042_v56 = vld [vmem:[#allocation8 + $0x5a8] ss:$16 sps:$4 sm:$0xff]   ;;  %v3047_v57 = vld [vmem:[#allocation8 + $0x5c4] ss:$16 sps:$4 sm:$0xff]  }
 0x17d   :  { %2164 = vmatprep.mubr.bf16.mxu0 %v489_v43  ;;  %2328 = vmatprep.mubr.bf16.mxu1 %v489_v43  ;;  %v3050_v43 = vld [vmem:[#allocation8 + $0x5cc] ss:$16 sps:$4 sm:$0xff]  }
 0x17f   :  { %2135 = vmatpush1.bf16.msra.mxu0 %v2967_v59  ;;  %2299 = vmatpush1.bf16.msra.mxu1 %v2970_v60  ;;  %v139_v59 = vrot.slane %v3386_v7, %v138_v53  ;;  %v429_v60 = vadd.f32 %v3401_v42, %v127_v54  ;;  %v3111_v53 = vld [vmem:[#allocation8 + $0x720] ss:$16 sps:$4 sm:$0xff]   ;;  %v3114_v54 = vld [vmem:[#allocation8 + $0x728] ss:$16 sps:$4 sm:$0xff]  }
 0x180   :  { %2136 = vmatprep.subr.bf16.mxu0 %v2975_v62  ;;  %2300 = vmatprep.subr.bf16.mxu1 %v2978_v63  ;;  %v3045_v62 = vld [vmem:[#allocation8 + $0x5c0] ss:$16 sps:$4 sm:$0xff]   ;;  %v3048_v63 = vld [vmem:[#allocation8 + $0x5c8] ss:$16 sps:$4 sm:$0xff]  }
 0x183   :  { %2137 = vmatpush1.bf16.msra.mxu0 %v2973_v1  ;;  %2301 = vmatpush1.bf16.msra.mxu1 %v2976_v2  ;;  %v3053_v1 = vld [vmem:[#allocation8 + $0x5e4] ss:$16 sps:$4 sm:$0xff]   ;;  %v3056_v2 = vld [vmem:[#allocation8 + $0x5ec] ss:$16 sps:$4 sm:$0xff]  }
 0x184   :  { %2138 = vmatprep.subr.bf16.mxu0 %v2981_v3  ;;  %2302 = vmatprep.subr.bf16.mxu1 %v2984_v4  ;;  %v472_v3 = vadd.f32 %v3407_v61, %v139_v59  ;;  %v480_v4 = vmax.f32 %v429_v60, 0.0  ;;  %v3125_v59 = vld [vmem:[#allocation8 + $0x764] ss:$16 sps:$4 sm:$0xff]   ;;  %v3128_v60 = vld [vmem:[#allocation8 + $0x76c] ss:$16 sps:$4 sm:$0xff]  }
 0x186   :  { %v483_v42 = vmax.f32 %v472_v3, 0.0  ;;  %v3129_v3 = vld [vmem:[#allocation8 + $0x780] ss:$16 sps:$4 sm:$0xff]  }
 0x187   :  { %2139 = vmatpush1.bf16.msra.mxu0 %v2979_v0  ;;  %2303 = vmatpush1.bf16.msra.mxu1 %v2982_v9  ;;  %v3051_v0 = vld [vmem:[#allocation8 + $0x5e0] ss:$16 sps:$4 sm:$0xff]   ;;  %v3054_v9 = vld [vmem:[#allocation8 + $0x5e8] ss:$16 sps:$4 sm:$0xff]  }
 0x188   :  { %2140 = vmatprep.subr.bf16.mxu0 %v2987_v11  ;;  %2304 = vmatprep.subr.bf16.mxu1 %v2990_v12  ;;  %v3059_v11 = vld [vmem:[#allocation8 + $0x604] ss:$16 sps:$4 sm:$0xff]   ;;  %v3062_v12 = vld [vmem:[#allocation8 + $0x60c] ss:$16 sps:$4 sm:$0xff]   ;;  %v491_v61 = vpack.c.bf16 %v483_v42, %v483_v42  ;;  %v3138_v42 = vld [vmem:[#allocation8 + $0x7a8] ss:$16 sps:$4 sm:$0xff]  }
 0x18b   :  { %2141 = vmatpush1.bf16.msra.mxu0 %v2985_v13  ;;  %2305 = vmatpush1.bf16.msra.mxu1 %v2988_v14  ;;  %v488_v13 = vpack.c.bf16 %v480_v4, %v480_v4  ;;  %v3057_v14 = vld [vmem:[#allocation8 + $0x600] ss:$16 sps:$4 sm:$0xff]   ;;  %v3132_v4 = vld [vmem:[#allocation8 + $0x788] ss:$16 sps:$4 sm:$0xff]  }
 0x18c   :  { %2142 = vmatprep.subr.bf16.mxu0 %v2993_v15  ;;  %2306 = vmatprep.subr.bf16.mxu1 %v2996_v16  ;;  %v3060_v15 = vld [vmem:[#allocation8 + $0x608] ss:$16 sps:$4 sm:$0xff]   ;;  %v3065_v16 = vld [vmem:[#allocation8 + $0x624] ss:$16 sps:$4 sm:$0xff]  }
 0x18f   :  { %2143 = vmatpush1.bf16.msra.mxu0 %v2991_v17  ;;  %2307 = vmatpush1.bf16.msra.mxu1 %v2994_v18  ;;  %v3068_v17 = vld [vmem:[#allocation8 + $0x62c] ss:$16 sps:$4 sm:$0xff]   ;;  %v3063_v18 = vld [vmem:[#allocation8 + $0x620] ss:$16 sps:$4 sm:$0xff]  }
 0x190   :  { %2144 = vmatprep.subr.bf16.mxu0 %v2999_v19  ;;  %2308 = vmatprep.subr.bf16.mxu1 %v3002_v21  ;;  %v3066_v19 = vld [vmem:[#allocation8 + $0x628] ss:$16 sps:$4 sm:$0xff]   ;;  %v3071_v21 = vld [vmem:[#allocation8 + $0x644] ss:$16 sps:$4 sm:$0xff]  }
 0x193   :  { %2145 = vmatpush1.bf16.msra.mxu0 %v2997_v22  ;;  %2309 = vmatpush1.bf16.msra.mxu1 %v3000_v23  ;;  %v3074_v22 = vld [vmem:[#allocation8 + $0x64c] ss:$16 sps:$4 sm:$0xff]   ;;  %v3069_v23 = vld [vmem:[#allocation8 + $0x640] ss:$16 sps:$4 sm:$0xff]  }
 0x194   :  { %2146 = vmatprep.subr.bf16.mxu0 %v3005_v24  ;;  %2310 = vmatprep.subr.bf16.mxu1 %v3008_v25  ;;  %v3072_v24 = vld [vmem:[#allocation8 + $0x648] ss:$16 sps:$4 sm:$0xff]   ;;  %v3077_v25 = vld [vmem:[#allocation8 + $0x664] ss:$16 sps:$4 sm:$0xff]  }
 0x197   :  { %2147 = vmatpush1.bf16.msra.mxu0 %v3003_v26  ;;  %2311 = vmatpush1.bf16.msra.mxu1 %v3006_v27  ;;  %v3080_v26 = vld [vmem:[#allocation8 + $0x66c] ss:$16 sps:$4 sm:$0xff]   ;;  %v3075_v27 = vld [vmem:[#allocation8 + $0x660] ss:$16 sps:$4 sm:$0xff]  }
 0x198   :  { %2148 = vmatprep.subr.bf16.mxu0 %v3011_v29  ;;  %2312 = vmatprep.subr.bf16.mxu1 %v3014_v30  ;;  %v3078_v29 = vld [vmem:[#allocation8 + $0x668] ss:$16 sps:$4 sm:$0xff]   ;;  %v3083_v30 = vld [vmem:[#allocation8 + $0x684] ss:$16 sps:$4 sm:$0xff]  }
 0x19b   :  { %2149 = vmatpush1.bf16.msra.mxu0 %v3009_v31  ;;  %2313 = vmatpush1.bf16.msra.mxu1 %v3012_v32  ;;  %v3086_v31 = vld [vmem:[#allocation8 + $0x68c] ss:$16 sps:$4 sm:$0xff]   ;;  %v3081_v32 = vld [vmem:[#allocation8 + $0x680] ss:$16 sps:$4 sm:$0xff]  }
 0x19c   :  { %2150 = vmatprep.subr.bf16.mxu0 %v3017_v33  ;;  %2314 = vmatprep.subr.bf16.mxu1 %v3020_v34  ;;  %v3084_v33 = vld [vmem:[#allocation8 + $0x688] ss:$16 sps:$4 sm:$0xff]   ;;  %v3089_v34 = vld [vmem:[#allocation8 + $0x6a4] ss:$16 sps:$4 sm:$0xff]  }
 0x19f   :  { %2151 = vmatpush1.bf16.msra.mxu0 %v3015_v35  ;;  %2315 = vmatpush1.bf16.msra.mxu1 %v3018_v36  ;;  %v3092_v35 = vld [vmem:[#allocation8 + $0x6ac] ss:$16 sps:$4 sm:$0xff]   ;;  %v3087_v36 = vld [vmem:[#allocation8 + $0x6a0] ss:$16 sps:$4 sm:$0xff]  }
 0x1a0   :  { %2152 = vmatprep.subr.bf16.mxu0 %v3023_v37  ;;  %2316 = vmatprep.subr.bf16.mxu1 %v3026_v38  ;;  %v3090_v37 = vld [vmem:[#allocation8 + $0x6a8] ss:$16 sps:$4 sm:$0xff]   ;;  %v3095_v38 = vld [vmem:[#allocation8 + $0x6c4] ss:$16 sps:$4 sm:$0xff]  }
 0x1a3   :  { %2153 = vmatpush1.bf16.msra.mxu0 %v3021_v39  ;;  %2317 = vmatpush1.bf16.msra.mxu1 %v3024_v40  ;;  %v3098_v39 = vld [vmem:[#allocation8 + $0x6cc] ss:$16 sps:$4 sm:$0xff]   ;;  %v3093_v40 = vld [vmem:[#allocation8 + $0x6c0] ss:$16 sps:$4 sm:$0xff]  }
 0x1a4   :  { %2154 = vmatprep.subr.bf16.mxu0 %v3029_v41  ;;  %2318 = vmatprep.subr.bf16.mxu1 %v3032_v44  ;;  %v3096_v41 = vld [vmem:[#allocation8 + $0x6c8] ss:$16 sps:$4 sm:$0xff]   ;;  %v3101_v44 = vld [vmem:[#allocation8 + $0x6e4] ss:$16 sps:$4 sm:$0xff]  }
 0x1a7   :  { %2155 = vmatpush1.bf16.msra.mxu0 %v3027_v45  ;;  %2319 = vmatpush1.bf16.msra.mxu1 %v3030_v46  ;;  %v3104_v45 = vld [vmem:[#allocation8 + $0x6ec] ss:$16 sps:$4 sm:$0xff]   ;;  %v3099_v46 = vld [vmem:[#allocation8 + $0x6e0] ss:$16 sps:$4 sm:$0xff]  }
 0x1a8   :  { %2156 = vmatprep.subr.bf16.mxu0 %v3035_v47  ;;  %2320 = vmatprep.subr.bf16.mxu1 %v3038_v48  ;;  %v3102_v47 = vld [vmem:[#allocation8 + $0x6e8] ss:$16 sps:$4 sm:$0xff]   ;;  %v3107_v48 = vld [vmem:[#allocation8 + $0x704] ss:$16 sps:$4 sm:$0xff]  }
 0x1ab   :  { %2157 = vmatpush1.bf16.msra.mxu0 %v3033_v50  ;;  %2321 = vmatpush1.bf16.msra.mxu1 %v3036_v51  ;;  %v3105_v50 = vld [vmem:[#allocation8 + $0x700] ss:$16 sps:$4 sm:$0xff]   ;;  %v3108_v51 = vld [vmem:[#allocation8 + $0x708] ss:$16 sps:$4 sm:$0xff]  }
 0x1ac   :  { %2158 = vmatprep.subr.bf16.mxu0 %v3041_v52  ;;  %2322 = vmatprep.subr.bf16.mxu1 %v3044_v20  ;;  %v3113_v52 = vld [vmem:[#allocation8 + $0x724] ss:$16 sps:$4 sm:$0xff]   ;;  %v3116_v20 = vld [vmem:[#allocation8 + $0x72c] ss:$16 sps:$4 sm:$0xff]  }
 0x1af   :  { %2159 = vmatpush1.bf16.msra.mxu0 %v3039_v55  ;;  %2323 = vmatpush1.bf16.msra.mxu1 %v3042_v56  ;;  %v3119_v55 = vld [vmem:[#allocation8 + $0x744] ss:$16 sps:$4 sm:$0xff]   ;;  %v3122_v56 = vld [vmem:[#allocation8 + $0x74c] ss:$16 sps:$4 sm:$0xff]  }
 0x1b0   :  { %2160 = vmatprep.subr.bf16.mxu0 %v3047_v57  ;;  %2324 = vmatprep.subr.bf16.mxu1 %v3050_v43  ;;  %v3117_v57 = vld [vmem:[#allocation8 + $0x740] ss:$16 sps:$4 sm:$0xff]   ;;  %v3120_v43 = vld [vmem:[#allocation8 + $0x748] ss:$16 sps:$4 sm:$0xff]  }
 0x1b3   :  { %2161 = vmatpush1.bf16.msra.mxu0 %v3045_v62  ;;  %2325 = vmatpush1.bf16.msra.mxu1 %v3048_v63  ;;  %v3123_v62 = vld [vmem:[#allocation8 + $0x760] ss:$16 sps:$4 sm:$0xff]   ;;  %v3126_v63 = vld [vmem:[#allocation8 + $0x768] ss:$16 sps:$4 sm:$0xff]  }
 0x1b4   :  { %2162 = vmatprep.subr.bf16.mxu0 %v3053_v1  ;;  %2326 = vmatprep.subr.bf16.mxu1 %v3056_v2  ;;  %v3131_v1 = vld [vmem:[#allocation8 + $0x784] ss:$16 sps:$4 sm:$0xff]   ;;  %v3134_v2 = vld [vmem:[#allocation8 + $0x78c] ss:$16 sps:$4 sm:$0xff]  }
 0x1b7   :  { %2163 = vmatpush1.bf16.msra.mxu0 %v3051_v0  ;;  %2327 = vmatpush1.bf16.msra.mxu1 %v3054_v9  ;;  %v134_v0 = vsub.s32 6, %v3383_v5  ;;  %v3137_v9 = vld [vmem:[#allocation8 + $0x7a4] ss:$16 sps:$4 sm:$0xff]  }
 0x1b8   :  { %2173 = vmatprep.subr.bf16.mxu0 %v3059_v11  ;;  %2337 = vmatprep.subr.bf16.mxu1 %v3062_v12  ;;  %v3140_v11 = vld [vmem:[#allocation8 + $0x7ac] ss:$16 sps:$4 sm:$0xff]   ;;  %v3135_v12 = vld [vmem:[#allocation8 + $0x7a0] ss:$16 sps:$4 sm:$0xff]  }
 0x1ba   :  { %2165 = vmatmul.mubr.bf16.vlgmr.msra.gmra.mrb[8].mxu0 %v488_v13  ;;  %2329 = vmatmul.mubr.bf16.vlgmr.msra.gmra.mrb[8].mxu1 %v488_v13  ;;  %v135_v13 = vrot.slane %v3386_v7, %v134_v0 }
 0x1bb   :  { %2174 = vmatpush1.bf16.msra.mxu0 %v3057_v14  ;;  %2338 = vmatpush1.bf16.msra.mxu1 %v3060_v15  ;;  %v3143_v14 = vld [vmem:[#allocation8 + $0x7c4] ss:$16 sps:$4 sm:$0xff]   ;;  %v3146_v15 = vld [vmem:[#allocation8 + $0x7cc] ss:$16 sps:$4 sm:$0xff]  }
 0x1bc   :  { %2175 = vmatprep.subr.bf16.mxu0 %v3065_v16  ;;  %2339 = vmatprep.subr.bf16.mxu1 %v3068_v17  ;;  %v3141_v16 = vld [vmem:[#allocation8 + $0x7c0] ss:$16 sps:$4 sm:$0xff]   ;;  %v3144_v17 = vld [vmem:[#allocation8 + $0x7c8] ss:$16 sps:$4 sm:$0xff]  }
 0x1bd   :  { %2205 = vmatprep.mubr.bf16.mxu0 %v491_v61  ;;  %2369 = vmatprep.mubr.bf16.mxu1 %v491_v61  ;;  %v470_v61 = vadd.f32 %v3405_v58, %v135_v13  ;;  %v748_v58 = vld [vmem:[%s3453_s4] sm:$0xf]  ;;  %s3296_s4 = smov [#allocation10]  }
 0x1be   :  { %s2428_s1 = sshll.u32 %s3296_s4, 4  ;;  %s2429_s1 = int_to_ptr.vmem [resolvable:$true] %s2428_s1 }
 0x1bf   :  { %2176 = vmatpush1.bf16.msra.mxu0 %v3063_v18  ;;  %2340 = vmatpush1.bf16.msra.mxu1 %v3066_v19  ;;  %v3149_v18 = vld [vmem:[#allocation8 + $0x7e4] ss:$16 sps:$4 sm:$0xff]   ;;  %v3152_v19 = vld [vmem:[#allocation8 + $0x7ec] ss:$16 sps:$4 sm:$0xff]   ;;  %s3257_s18 = scalar_lea.vmem %s2429_s1, 256  ;;  %p3262_p5 = scmp.lt.s32.totalorder %s2429_s1, %s2429_s1 }
 0x1c0   :  { %2177 = vmatprep.subr.bf16.mxu0 %v3071_v21  ;;  %2341 = vmatprep.subr.bf16.mxu1 %v3074_v22  ;;  %v3147_v21 = vld [vmem:[#allocation8 + $0x7e0] ss:$16 sps:$4 sm:$0xff]   ;;  %v3150_v22 = vld [vmem:[#allocation8 + $0x7e8] ss:$16 sps:$4 sm:$0xff]   ;;  %p3258_p4 = scmp.ne.s32.totalorder %s2429_s1, %s3257_s18  ;;  %p3263_p6 = scmp.lt.s32.totalorder %s3257_s18, %s3257_s18 }
 0x1c2   :  { %p3264_p7 = por %p3263_p6, %p3262_p5 }
 0x1c3   :  { %2178 = vmatpush1.bf16.msra.mxu0 %v3069_v23  ;;  %2342 = vmatpush1.bf16.msra.mxu1 %v3072_v24  ;;  %v482_v23 = vmax.f32 %v470_v61, 0.0  ;;  %v753_v24 = vrot.slane %v748_v58, %v110_v6 }
 0x1c4   :  { %2179 = vmatprep.subr.bf16.mxu0 %v3077_v25  ;;  %2343 = vmatprep.subr.bf16.mxu1 %v3080_v26  ;;  %v761_v25 = vrot.slane %v748_v58, %v118_v28  ;;  %p3265_p8 = pnand %p3264_p7, %p3258_p4 }
 0x1c5   :  { %v490_v7 = vpack.c.bf16 %v482_v23, %v482_v23 }
 0x1c7   :  { %2180 = vmatpush1.bf16.msra.mxu0 %v3075_v27  ;;  %2344 = vmatpush1.bf16.msra.mxu1 %v3078_v29 }
 0x1c8   :  { %2181 = vmatprep.subr.bf16.mxu0 %v3083_v30  ;;  %2345 = vmatprep.subr.bf16.mxu1 %v3086_v31  ;;  %v757_v31 = vrot.slane %v748_v58, %v114_v8 }
 0x1cb   :  { %2182 = vmatpush1.bf16.msra.mxu0 %v3081_v32  ;;  %2346 = vmatpush1.bf16.msra.mxu1 %v3084_v33  ;;  %v765_v33 = vrot.slane %v748_v58, %v122_v10 }
 0x1cc   :  { %2183 = vmatprep.subr.bf16.mxu0 %v3089_v34  ;;  %2347 = vmatprep.subr.bf16.mxu1 %v3092_v35 }
 0x1cf   :  { %2184 = vmatpush1.bf16.msra.mxu0 %v3087_v36  ;;  %2348 = vmatpush1.bf16.msra.mxu1 %v3090_v37 }
 0x1d0   :  { %2185 = vmatprep.subr.bf16.mxu0 %v3095_v38  ;;  %2349 = vmatprep.subr.bf16.mxu1 %v3098_v39 }
 0x1d3   :  { %2186 = vmatpush1.bf16.msra.mxu0 %v3093_v40  ;;  %2350 = vmatpush1.bf16.msra.mxu1 %v3096_v41 }
 0x1d4   :  { %2187 = vmatprep.subr.bf16.mxu0 %v3101_v44  ;;  %2351 = vmatprep.subr.bf16.mxu1 %v3104_v45 }
 0x1d7   :  { %2188 = vmatpush1.bf16.msra.mxu0 %v3099_v46  ;;  %2352 = vmatpush1.bf16.msra.mxu1 %v3102_v47 }
 0x1d8   :  { %2189 = vmatprep.subr.bf16.mxu0 %v3107_v48  ;;  %2353 = vmatprep.subr.bf16.mxu1 %v3110_v49 }
 0x1db   :  { %2190 = vmatpush1.bf16.msra.mxu0 %v3105_v50  ;;  %2354 = vmatpush1.bf16.msra.mxu1 %v3108_v51 }
 0x1dc   :  { %2191 = vmatprep.subr.bf16.mxu0 %v3113_v52  ;;  %2355 = vmatprep.subr.bf16.mxu1 %v3116_v20 }
 0x1df   :  { %2192 = vmatpush1.bf16.msra.mxu0 %v3111_v53  ;;  %2356 = vmatpush1.bf16.msra.mxu1 %v3114_v54 }
 0x1e0   :  { %2193 = vmatprep.subr.bf16.mxu0 %v3119_v55  ;;  %2357 = vmatprep.subr.bf16.mxu1 %v3122_v56 }
 0x1e3   :  { %2194 = vmatpush1.bf16.msra.mxu0 %v3117_v57  ;;  %2358 = vmatpush1.bf16.msra.mxu1 %v3120_v43 }
 0x1e4   :  { %2195 = vmatprep.subr.bf16.mxu0 %v3125_v59  ;;  %2359 = vmatprep.subr.bf16.mxu1 %v3128_v60 }
 0x1e7   :  { %2196 = vmatpush1.bf16.msra.mxu0 %v3123_v62  ;;  %2360 = vmatpush1.bf16.msra.mxu1 %v3126_v63 }
 0x1e8   :  { %2197 = vmatprep.subr.bf16.mxu0 %v3131_v1  ;;  %2361 = vmatprep.subr.bf16.mxu1 %v3134_v2 }
 0x1eb   :  { %2198 = vmatpush1.bf16.msra.mxu0 %v3129_v3  ;;  %2362 = vmatpush1.bf16.msra.mxu1 %v3132_v4 }
 0x1ec   :  { %2199 = vmatprep.subr.bf16.mxu0 %v3137_v9  ;;  %2363 = vmatprep.subr.bf16.mxu1 %v3140_v11 }
 0x1ef   :  { %2200 = vmatpush1.bf16.msra.mxu0 %v3135_v12  ;;  %2364 = vmatpush1.bf16.msra.mxu1 %v3138_v42 }
 0x1f0   :  { %2201 = vmatprep.subr.bf16.mxu0 %v3143_v14  ;;  %2365 = vmatprep.subr.bf16.mxu1 %v3146_v15 }
 0x1f3   :  { %2202 = vmatpush1.bf16.msra.mxu0 %v3141_v16  ;;  %2366 = vmatpush1.bf16.msra.mxu1 %v3144_v17 }
 0x1f4   :  { %2203 = vmatprep.subr.bf16.mxu0 %v3149_v18  ;;  %2367 = vmatprep.subr.bf16.mxu1 %v3152_v19 }
 0x1f7   :  { %2204 = vmatpush1.bf16.msra.mxu0 %v3147_v21  ;;  %2368 = vmatpush1.bf16.msra.mxu1 %v3150_v22 }
 0x1fa   :  { %2206 = vmatmul.mubr.bf16.vlgmr.msra.gmra.mrb[8].mxu0 %v490_v7  ;;  %2370 = vmatmul.mubr.bf16.vlgmr.msra.gmra.mrb[8].mxu1 %v490_v7 }
 0x2cd   :  { %v2207_v26 = vpop.f32.mrb[8].mxu0  ;;  %v2371_v27 = vpop.f32.mrb[8].mxu1 }
 0x2ce   :  { %v2731_v29 = vadd.f32 %v2207_v26, %v753_v24  ;;  %v2733_v30 = vadd.f32 %v2371_v27, %v761_v25  ;;  %v2209_v32 = vpop.f32.mrb[9].mxu0  ;;  %v2373_v34 = vpop.f32.mrb[9].mxu1 }
 0x2cf   :  { %v2211_v35 = vpop.f32.mrb[10].mxu0  ;;  %v2375_v36 = vpop.f32.mrb[10].mxu1  ;;  %v2732_v38 = vadd.f32 %v2209_v32, %v757_v31  ;;  %v2734_v28 = vadd.f32 %v2373_v34, %v765_v33 }
 0x2d0   :  { %v2376_v37 = vpop.f32.mrb[11].mxu1  ;;  %2400 = vmax.xlane.f32.xlu1 %v2733_v30  ;;  %v2212_v6 = vpop.f32.mrb[11].mxu0  ;;  %2378 = vmax.xlane.f32.xlu0 %v2731_v29 }
 0x2d4   :  { %2411 = vmax.xlane.f32.xlu1 %v2734_v28  ;;  %2389 = vmax.xlane.f32.xlu0 %v2732_v38 }
 0x35d   :  { %v2401_v39 = vpop.xlane.xlu1 %2400  ;;  %v2379_v40 = vpop.xlane.xlu0 %2378 }
 0x35e   :  { %v2402_v41 = vsub.f32 %v2733_v30, %v2401_v39  ;;  %v2380_v44 = vsub.f32 %v2731_v29, %v2379_v40 }
 0x360   :  { %v2381_v8 = vmul.f32 1.442695, %v2380_v44  ;;  %v2403_v5 = vmul.f32 1.442695, %v2402_v41 }
 0x361   :  { %v2412_v45 = vpop.xlane.xlu1 %2411  ;;  %v2390_v46 = vpop.xlane.xlu0 %2389 }
 0x362   :  { %v2391_v10 = vsub.f32 %v2732_v38, %v2390_v46  ;;  %3153 = vpow2.f32 %v2381_v8  ;;  %v2413_v47 = vsub.f32 %v2734_v28, %v2412_v45 }
 0x363   :  { %3155 = vpow2.f32 %v2403_v5 }
 0x364   :  { %v2392_v48 = vmul.f32 1.442695, %v2391_v10  ;;  %v2414_v49 = vmul.f32 1.442695, %v2413_v47 }
 0x366   :  { %3157 = vpow2.f32 %v2392_v48 }
 0x367   :  { %3159 = vpow2.f32 %v2414_v49 }
 0x36c   :  { %v3154_v50 = vpop.eup %3153 }
 0x36d   :  { %2383 = vadd.xlane.f32.xlu0 %v3154_v50  ;;  %v3156_v51 = vpop.eup %3155 }
 0x370   :  { %v3158_v52 = vpop.eup %3157 }
 0x371   :  { %2405 = vadd.xlane.f32.xlu0 %v3156_v51  ;;  %2394 = vadd.xlane.f32.xlu1 %v3158_v52  ;;  %v3160_v20 = vpop.eup %3159 }
 0x375   :  { %2416 = vadd.xlane.f32.xlu1 %v3160_v20 }
 0x3fa   :  { %v2384_v53 = vpop.xlane.xlu0 %2383 }
 0x3fb   :  { %3161 = vrcp.f32 %v2384_v53 }
 0x3fe   :  { %v2395_v54 = vpop.xlane.xlu1 %2394  ;;  %v2406_v55 = vpop.xlane.xlu0 %2405 }
 0x3ff   :  { %3163 = vrcp.f32 %v2395_v54 }
 0x400   :  { %3165 = vrcp.f32 %v2406_v55 }
 0x402   :  { %v2417_v56 = vpop.xlane.xlu1 %2416 }
 0x403   :  { %3167 = vrcp.f32 %v2417_v56 }
 0x405   :  { %v3162_v57 = vpop.eup %3161 }
 0x406   :  { %v2386_v43 = vmul.f32 %v3162_v57, %v3154_v50 }
 0x408   :  { %v2387_v59 = vpack.c.bf16 %v2386_v43, %v2386_v43 }
 0x409   :  { %v3164_v60 = vpop.eup %3163 }
 0x40a   :  { %v3166_v62 = vpop.eup %3165  ;;  %2388 = vst [vmem:[#allocation10] sm:$0xf] %v2387_v59  ;;  %v2397_v63 = vmul.f32 %v3164_v60, %v3158_v52 }
 0x40b   :  { %v2408_v1 = vmul.f32 %v3166_v62, %v3156_v51 }
 0x40c   :  { %v2398_v2 = vpack.c.bf16 %v2397_v63, %v2397_v63 }
 0x40d   :  { %v3168_v3 = vpop.eup %3167  ;;  %v2409_v4 = vpack.c.bf16 %v2408_v1, %v2408_v1 }
 0x40e   :  { %v2419_v0 = vmul.f32 %v3168_v3, %v3160_v20  ;;  %2399 = vst [vmem:[#allocation10 + $0x4] sm:$0xf] %v2398_v2 }
 0x40f   :  { %2410 = vst [vmem:[#allocation10 + $0x8] sm:$0xf] %v2409_v4 }
 0x410   :  { %v2420_v9 = vpack.c.bf16 %v2419_v0, %v2419_v0 }
 0x412   :  { %2421 = vst [vmem:[#allocation10 + $0xc] sm:$0xf] %v2420_v9 }
 0x413   :  { %3268 = shalt.err (!%p3265_p8)
}
 0x414   :  { %s3269_s21 = scalar_lea.hbm %s3454_s5, 256 }
 0x415   :  { %p3270_p9 = scmp.ne.s32.totalorder %s3454_s5, %s3269_s21  ;;  %p3273_p10 = scmp.lt.u32.totalorder %s3269_s21, %s3454_s5 }
 0x417   :  { %p3275_p11 = pnand %p3273_p10, %p3270_p9 }
 0x419   :  { %3278 = shalt.err (!%p3275_p11)
}
 0x41a   :  { %2431 = dma.vmem_to_hbm [thread:$0]  %s2429_s1, 256, %s3454_s5, [#allocation4]  }
 0x41b   :  { %3285 = dma.done.wait [#allocation4], 256  }
 0x41c   :  { %3286 = vsyncadd [#allocation4], 4294967040 }
 0x41d   :  { %2435 = vsyncpa [#allocation3], 1 }
 0x41e   :  { %2436 = vsyncpa [#allocation6], 1 }
 0x41f   :  { %2437 = vsyncpa [#allocation9], 1 }
 0x420   :  { %2438 = vsyncpa [#allocation4], 1 }

</bundles_post_ra>
